<compile_context>
chip_gen: v7x
topology: tpu7x:2x2x1
jax: 0.10.0
libtpu: 0.0.40
codegen_flags: <defaults>
</compile_context>

<pallas_src>
import math
import jax
import jax.numpy as jnp
from jax import lax
from jax.experimental import pallas as pl
from jax.experimental.pallas import tpu as pltpu

# ---------------- model hyper-parameters (small, deterministic) ----------------
N_LAYERS = 2      # Encoder stack depth N
D_MODEL  = 32     # layer.size
N_HEADS  = 4
D_FF     = 64
SEQ      = 8
BATCH    = 2
EPS      = 1e-16  # LayerNorm eps from the reference module

# row layout of the packed constants slab (one parameter vector per sublane row)
_C_BQKV, _C_BO, _C_B1, _C_B2, _C_GA0, _C_GB0, _C_GA1, _C_GB1 = range(8)
_C_PER_LAYER = 8


def _layer_norm(v, gain, bias, d):
    """Reference LayerNorm: a*(x-mean)/(std+eps)+b with unbiased std.

    Uses a single EUP rsqrt on (var + eps^2); deviates from the reference only
    when std ~ eps (documented tolerance, not bit-exactness)."""
    mean = jnp.sum(v, axis=-1, keepdims=True) * (1.0 / d)
    cent = v - mean
    var = jnp.sum(cent * cent, axis=-1, keepdims=True) * (1.0 / (d - 1))
    return gain * cent * lax.rsqrt(var + EPS * EPS) + bias


def encoder_kernel(x_ref, maskadd_ref, wqkv_ref, wo_ref, w1_ref, w2_ref, c_ref,
                   out_ref):
    b, _, s = maskadd_ref.shape          # (B, 1, S)
    r, d = x_ref.shape                   # (B*S, D)
    h = N_HEADS
    dk = d // h
    scale = 1.0 / math.sqrt(dk)

    x = x_ref[...]                                            # (R, D)

    # Additive mask (0 keep / -1e9 masked), broadcast ONCE to the (group, 1, S)
    # layout with group index g = head * B + batch.
    mask_add = maskadd_ref[...]                               # (B, 1, S)
    mask_g = jnp.broadcast_to(mask_add[None], (h, b, 1, s)).reshape(h * b, 1, s)

    def crow(row, width):
        # one (1, width) parameter vector from the packed constants slab
        return c_ref[row:row + 1, :][:, :width]

    for l in range(N_LAYERS):                                 # static unroll (L = 2)
        base = l * _C_PER_LAYER
        bqkv = crow(base + _C_BQKV, 3 * d)
        bo   = crow(base + _C_BO, d)
        b1   = crow(base + _C_B1, D_FF)
        b2   = crow(base + _C_B2, d)
        ga0  = crow(base + _C_GA0, d)
        gb0  = crow(base + _C_GB0, d)
        ga1  = crow(base + _C_GA1, d)
        gb1  = crow(base + _C_GB1, d)

        # ----- sublayer 0: multi-head self-attention with residual -----
        xn = _layer_norm(x, ga0, gb0, d)                      # (R, D)
        # fused QKV projection: ONE matmul, N = 3*D lanes
        qkv = jnp.dot(xn, wqkv_ref[l],
                      preferred_element_type=jnp.float32) + bqkv          # (R, 3D)
        qkv3 = qkv.reshape(b, s, 3 * d)                        # free leading split

        def split_heads(off):
            # lane blocks -> head-major leading axis; group g = head * B + batch
            return jnp.concatenate(
                [qkv3[:, :, off + i * dk: off + (i + 1) * dk] for i in range(h)],
                axis=0)                                        # (H*B, S, dk)

        q = split_heads(0)
        k = split_heads(d)
        v = split_heads(2 * d)

        scores = jnp.einsum('gqe,gke->gqk', q, k,
                            preferred_element_type=jnp.float32) * scale + mask_g
        scores = scores - jnp.max(scores, axis=-1, keepdims=True)
        p = jnp.exp(scores)
        p = p * pl.reciprocal(jnp.sum(p, axis=-1, keepdims=True), approx=True)
        ctx = jnp.einsum('gqk,gke->gqe', p, v,
                         preferred_element_type=jnp.float32)   # (H*B, S, dk)

        # merge heads back into lanes (column h*dk+e matches Wo's row layout),
        # then a single K = D output projection
        ctx_m = jnp.concatenate([ctx[i * b:(i + 1) * b] for i in range(h)],
                                axis=-1).reshape(r, d)         # (R, D)
        x = x + jnp.dot(ctx_m, wo_ref[l], preferred_element_type=jnp.float32) + bo
        # TODO(synk): dropout on the sublayer output omitted (eval mode / p = 0)

        # ----- sublayer 1: position-wise feed-forward with residual -----
        xn = _layer_norm(x, ga1, gb1, d)
        h1 = jnp.maximum(
            jnp.dot(xn, w1_ref[l], preferred_element_type=jnp.float32) + b1, 0.0)
        x = x + jnp.dot(h1, w2_ref[l], preferred_element_type=jnp.float32) + b2

    # final Encoder LayerNorm
    fa = crow(N_LAYERS * _C_PER_LAYER + 0, d)
    fb = crow(N_LAYERS * _C_PER_LAYER + 1, d)
    out_ref[...] = _layer_norm(x, fa, fb, d)


def _pack_params(p):
    """Repack reference parameters: fused Wqkv + one lane-padded constants slab."""
    L = N_LAYERS

    wqkv = jnp.concatenate([p["wq"], p["wk"], p["wv"]], axis=-1)   # (L, D, 3D)

    def row(v):                                                    # (n,) -> (1, 128)
        return jnp.pad(v, (0, 128 - v.shape[0]))[None, :]

    rows = []
    for l in range(L):                       # order must match the _C_* constants
        rows += [
            row(jnp.concatenate([p["bq"][l], p["bk"][l], p["bv"][l]])),  # bqkv
            row(p["bo"][l]), row(p["b1"][l]), row(p["b2"][l]),
            row(p["sa"][l, 0]), row(p["sb"][l, 0]),
            row(p["sa"][l, 1]), row(p["sb"][l, 1]),
        ]
    rows += [row(p["fa"]), row(p["fb"])]
    consts = jnp.concatenate(rows, axis=0).astype(jnp.float32)     # (L*8+2, 128)

    return {"wqkv": wqkv, "wo": p["wo"], "w1": p["w1"], "w2": p["w2"],
            "consts": consts}


def encoder_forward(x, mask, params):
    """x: (B, S, D) f32; mask: (B, 1, S) f32 with 1 = attend, 0 = masked."""
    B, S, D = x.shape
    kp = _pack_params(params)

    # additive mask (0 keep / -1e9 masked), computed once in the wrapper
    mask_add = ((1.0 - mask) * jnp.float32(-1e9)).astype(jnp.float32)

    # whole forward in ONE grid step on ONE TensorCore (workload far too small to
    # amortize a second core / extra grid steps on any generation, incl. v7x)
    x2 = x.reshape(B * S, D)

    def full(a):
        n = a.ndim
        return pl.BlockSpec(a.shape, lambda i, _n=n: (0,) * _n)

    out = pl.pallas_call(
        encoder_kernel,
        out_shape=jax.ShapeDtypeStruct((B * S, D), jnp.float32),
        grid_spec=pl.GridSpec(
            grid=(1,),
            in_specs=[
                full(x2), full(mask_add),
                full(kp["wqkv"]), full(kp["wo"]),
                full(kp["w1"]), full(kp["w2"]),
                full(kp["consts"]),
            ],
            out_specs=pl.BlockSpec((B * S, D), lambda i: (0, 0)),
        ),
        compiler_params=pltpu.CompilerParams(dimension_semantics=("arbitrary",)),
    )(x2, mask_add, kp["wqkv"], kp["wo"], kp["w1"], kp["w2"], kp["consts"])

    return out.reshape(B, S, D)


def init_params(key):
    ks = jax.random.split(key, 8)
    f = jnp.float32
    return {
        "wq": 0.02 * jax.random.normal(ks[0], (N_LAYERS, D_MODEL, D_MODEL), f),
        "wk": 0.02 * jax.random.normal(ks[1], (N_LAYERS, D_MODEL, D_MODEL), f),
        "wv": 0.02 * jax.random.normal(ks[2], (N_LAYERS, D_MODEL, D_MODEL), f),
        "wo": 0.02 * jax.random.normal(ks[3], (N_LAYERS, D_MODEL, D_MODEL), f),
        "w1": 0.02 * jax.random.normal(ks[4], (N_LAYERS, D_MODEL, D_FF), f),
        "w2": 0.02 * jax.random.normal(ks[5], (N_LAYERS, D_FF, D_MODEL), f),
        "bq": jnp.zeros((N_LAYERS, D_MODEL), f),
        "bk": jnp.zeros((N_LAYERS, D_MODEL), f),
        "bv": jnp.zeros((N_LAYERS, D_MODEL), f),
        "bo": jnp.zeros((N_LAYERS, D_MODEL), f),
        "b1": jnp.zeros((N_LAYERS, D_FF), f),
        "b2": jnp.zeros((N_LAYERS, D_MODEL), f),
        "sa": jnp.ones((N_LAYERS, 2, D_MODEL), f),   # sublayer LayerNorm a_2
        "sb": jnp.zeros((N_LAYERS, 2, D_MODEL), f),  # sublayer LayerNorm b_2
        "fa": jnp.ones((D_MODEL,), f),               # final LayerNorm a_2
        "fb": jnp.zeros((D_MODEL,), f),              # final LayerNorm b_2
    }


if __name__ == "__main__":
    key = jax.random.PRNGKey(0)
    k_x, k_p = jax.random.split(key)

    x = jax.random.normal(k_x, (BATCH, SEQ, D_MODEL), jnp.float32)
    # src mask: first sequence fully valid, second sequence padded after position 6
    lengths = jnp.array([SEQ, 6], dtype=jnp.int32)
    pos = jnp.arange(SEQ)[None, None, :]
    mask = (pos < lengths[:, None, None]).astype(jnp.float32)  # (B, 1, S)

    params = init_params(k_p)

    out = encoder_forward(x, mask, params)
    out = jax.block_until_ready(out)
    assert out.shape == (BATCH, SEQ, D_MODEL)
    assert bool(jnp.all(jnp.isfinite(out)))
    print("KERNEL_OK")
</pallas_src>

<mosaic_0001>
module attributes {stable_mosaic.version = 11 : i64} {
  func.func @encoder_kernel(%arg0: i32, %arg1: memref<16x32xf32, #tpu.memory_space<vmem>>, %arg2: memref<2x1x8xf32, #tpu.memory_space<vmem>>, %arg3: memref<2x32x96xf32, #tpu.memory_space<vmem>>, %arg4: memref<2x32x32xf32, #tpu.memory_space<vmem>>, %arg5: memref<2x32x64xf32, #tpu.memory_space<vmem>>, %arg6: memref<2x64x32xf32, #tpu.memory_space<vmem>>, %arg7: memref<18x128xf32, #tpu.memory_space<vmem>>, %arg8: memref<16x32xf32, #tpu.memory_space<vmem>>) attributes {dimension_semantics = [#tpu.dimension_semantics<arbitrary>], iteration_bounds = array<i64: 1>, scalar_prefetch = 0 : i64, scratch_operands = 0 : i64, tpu.core_type = #tpu.core_type<tc>, window_params = [{pipeline_mode = #tpu.pipeline_mode<synchronous>, transform_indices = @transform_0, window_bounds = array<i64: 16, 32>}, {pipeline_mode = #tpu.pipeline_mode<synchronous>, transform_indices = @transform_1, window_bounds = array<i64: 2, 1, 8>}, {pipeline_mode = #tpu.pipeline_mode<synchronous>, transform_indices = @transform_2, window_bounds = array<i64: 2, 32, 96>}, {pipeline_mode = #tpu.pipeline_mode<synchronous>, transform_indices = @transform_3, window_bounds = array<i64: 2, 32, 32>}, {pipeline_mode = #tpu.pipeline_mode<synchronous>, transform_indices = @transform_4, window_bounds = array<i64: 2, 32, 64>}, {pipeline_mode = #tpu.pipeline_mode<synchronous>, transform_indices = @transform_5, window_bounds = array<i64: 2, 64, 32>}, {pipeline_mode = #tpu.pipeline_mode<synchronous>, transform_indices = @transform_6, window_bounds = array<i64: 18, 128>}, {pipeline_mode = #tpu.pipeline_mode<synchronous>, transform_indices = @transform_7, window_bounds = array<i64: 16, 32>}]} {
    %c0 = arith.constant 0 : index
    %c0_0 = arith.constant 0 : index
    %0 = vector.load %arg1[%c0, %c0_0] : memref<16x32xf32, #tpu.memory_space<vmem>>, vector<16x32xf32>
    %c0_1 = arith.constant 0 : index
    %c0_2 = arith.constant 0 : index
    %c0_3 = arith.constant 0 : index
    %1 = vector.load %arg2[%c0_1, %c0_2, %c0_3] : memref<2x1x8xf32, #tpu.memory_space<vmem>>, vector<2x1x8xf32>
    %2 = vector.shape_cast %1 : vector<2x1x8xf32> to vector<1x2x1x8xf32>
    %3 = vector.shape_cast %2 : vector<1x2x1x8xf32> to vector<1x2x1x8xf32>
    %4 = vector.broadcast %3 : vector<1x2x1x8xf32> to vector<4x2x1x8xf32>
    %5 = vector.shape_cast %4 : vector<4x2x1x8xf32> to vector<8x1x8xf32>
    %c0_4 = arith.constant 0 : index
    %c0_5 = arith.constant 0 : index
    %6 = vector.load %arg7[%c0_4, %c0_5] : memref<18x128xf32, #tpu.memory_space<vmem>>, vector<1x128xf32>
    %7 = vector.extract_strided_slice %6 {offsets = [0, 0], sizes = [1, 96], strides = [1, 1]} : vector<1x128xf32> to vector<1x96xf32>
    %c1 = arith.constant 1 : index
    %c0_6 = arith.constant 0 : index
    %8 = vector.load %arg7[%c1, %c0_6] : memref<18x128xf32, #tpu.memory_space<vmem>>, vector<1x128xf32>
    %9 = vector.extract_strided_slice %8 {offsets = [0, 0], sizes = [1, 32], strides = [1, 1]} : vector<1x128xf32> to vector<1x32xf32>
    %c2 = arith.constant 2 : index
    %c0_7 = arith.constant 0 : index
    %10 = vector.load %arg7[%c2, %c0_7] : memref<18x128xf32, #tpu.memory_space<vmem>>, vector<1x128xf32>
    %11 = vector.extract_strided_slice %10 {offsets = [0, 0], sizes = [1, 64], strides = [1, 1]} : vector<1x128xf32> to vector<1x64xf32>
    %c3 = arith.constant 3 : index
    %c0_8 = arith.constant 0 : index
    %12 = vector.load %arg7[%c3, %c0_8] : memref<18x128xf32, #tpu.memory_space<vmem>>, vector<1x128xf32>
    %13 = vector.extract_strided_slice %12 {offsets = [0, 0], sizes = [1, 32], strides = [1, 1]} : vector<1x128xf32> to vector<1x32xf32>
    %c4 = arith.constant 4 : index
    %c0_9 = arith.constant 0 : index
    %14 = vector.load %arg7[%c4, %c0_9] : memref<18x128xf32, #tpu.memory_space<vmem>>, vector<1x128xf32>
    %15 = vector.extract_strided_slice %14 {offsets = [0, 0], sizes = [1, 32], strides = [1, 1]} : vector<1x128xf32> to vector<1x32xf32>
    %c5 = arith.constant 5 : index
    %c0_10 = arith.constant 0 : index
    %16 = vector.load %arg7[%c5, %c0_10] : memref<18x128xf32, #tpu.memory_space<vmem>>, vector<1x128xf32>
    %17 = vector.extract_strided_slice %16 {offsets = [0, 0], sizes = [1, 32], strides = [1, 1]} : vector<1x128xf32> to vector<1x32xf32>
    %c6 = arith.constant 6 : index
    %c0_11 = arith.constant 0 : index
    %18 = vector.load %arg7[%c6, %c0_11] : memref<18x128xf32, #tpu.memory_space<vmem>>, vector<1x128xf32>
    %19 = vector.extract_strided_slice %18 {offsets = [0, 0], sizes = [1, 32], strides = [1, 1]} : vector<1x128xf32> to vector<1x32xf32>
    %c7 = arith.constant 7 : index
    %c0_12 = arith.constant 0 : index
    %20 = vector.load %arg7[%c7, %c0_12] : memref<18x128xf32, #tpu.memory_space<vmem>>, vector<1x128xf32>
    %21 = vector.extract_strided_slice %20 {offsets = [0, 0], sizes = [1, 32], strides = [1, 1]} : vector<1x128xf32> to vector<1x32xf32>
    %cst = arith.constant dense<0.000000e+00> : vector<16xf32>
    %22 = vector.multi_reduction <add>, %0, %cst [1] : vector<16x32xf32> to vector<16xf32>
    %23 = vector.shape_cast %22 : vector<16xf32> to vector<16x1xf32>
    %cst_13 = arith.constant 3.125000e-02 : f32
    %24 = vector.broadcast %cst_13 : f32 to vector<16x1xf32>
    %25 = arith.mulf %23, %24 : vector<16x1xf32>
    %26 = vector.broadcast %25 : vector<16x1xf32> to vector<16x32xf32>
    %27 = arith.subf %0, %26 : vector<16x32xf32>
    %28 = arith.mulf %27, %27 : vector<16x32xf32>
    %cst_14 = arith.constant dense<0.000000e+00> : vector<16xf32>
    %29 = vector.multi_reduction <add>, %28, %cst_14 [1] : vector<16x32xf32> to vector<16xf32>
    %30 = vector.shape_cast %29 : vector<16xf32> to vector<16x1xf32>
    %cst_15 = arith.constant 0.0322580636 : f32
    %31 = vector.broadcast %cst_15 : f32 to vector<16x1xf32>
    %32 = arith.mulf %30, %31 : vector<16x1xf32>
    %33 = vector.broadcast %15 : vector<1x32xf32> to vector<16x32xf32>
    %34 = arith.mulf %33, %27 : vector<16x32xf32>
    %cst_16 = arith.constant 1.000000e-32 : f32
    %35 = vector.broadcast %cst_16 : f32 to vector<16x1xf32>
    %36 = arith.addf %32, %35 : vector<16x1xf32>
    %37 = math.rsqrt %36 : vector<16x1xf32>
    %38 = vector.broadcast %37 : vector<16x1xf32> to vector<16x32xf32>
    %39 = arith.mulf %34, %38 : vector<16x32xf32>
    %40 = vector.broadcast %17 : vector<1x32xf32> to vector<16x32xf32>
    %41 = arith.addf %39, %40 : vector<16x32xf32>
    %c0_17 = arith.constant 0 : index
    %c0_18 = arith.constant 0 : index
    %c0_19 = arith.constant 0 : index
    %42 = vector.load %arg3[%c0_17, %c0_18, %c0_19] : memref<2x32x96xf32, #tpu.memory_space<vmem>>, vector<1x32x96xf32>
    %43 = vector.shape_cast %42 : vector<1x32x96xf32> to vector<32x96xf32>
    %cst_20 = arith.constant dense<0.000000e+00> : vector<16x96xf32>
    %44 = tpu.matmul %41, %43, %cst_20 {dimension_numbers = #tpu.dot_dimension_numbers<[1], [0], [0], [1], [0, 0, 1, 1], [], []>} : vector<16x32xf32>, vector<32x96xf32>, vector<16x96xf32> -> vector<16x96xf32>
    %45 = vector.broadcast %7 : vector<1x96xf32> to vector<16x96xf32>
    %46 = arith.addf %44, %45 : vector<16x96xf32>
    %47 = vector.shape_cast %46 : vector<16x96xf32> to vector<2x8x96xf32>
    %48 = vector.extract_strided_slice %47 {offsets = [0, 0, 0], sizes = [2, 8, 8], strides = [1, 1, 1]} : vector<2x8x96xf32> to vector<2x8x8xf32>
    %49 = vector.extract_strided_slice %47 {offsets = [0, 0, 8], sizes = [2, 8, 8], strides = [1, 1, 1]} : vector<2x8x96xf32> to vector<2x8x8xf32>
    %50 = vector.extract_strided_slice %47 {offsets = [0, 0, 16], sizes = [2, 8, 8], strides = [1, 1, 1]} : vector<2x8x96xf32> to vector<2x8x8xf32>
    %51 = vector.extract_strided_slice %47 {offsets = [0, 0, 24], sizes = [2, 8, 8], strides = [1, 1, 1]} : vector<2x8x96xf32> to vector<2x8x8xf32>
    %52 = tpu.concatenate %48, %49, %50, %51 in 0 : vector<2x8x8xf32>, vector<2x8x8xf32>, vector<2x8x8xf32>, vector<2x8x8xf32> -> vector<8x8x8xf32>
    %53 = vector.extract_strided_slice %47 {offsets = [0, 0, 32], sizes = [2, 8, 8], strides = [1, 1, 1]} : vector<2x8x96xf32> to vector<2x8x8xf32>
    %54 = vector.extract_strided_slice %47 {offsets = [0, 0, 40], sizes = [2, 8, 8], strides = [1, 1, 1]} : vector<2x8x96xf32> to vector<2x8x8xf32>
    %55 = vector.extract_strided_slice %47 {offsets = [0, 0, 48], sizes = [2, 8, 8], strides = [1, 1, 1]} : vector<2x8x96xf32> to vector<2x8x8xf32>
    %56 = vector.extract_strided_slice %47 {offsets = [0, 0, 56], sizes = [2, 8, 8], strides = [1, 1, 1]} : vector<2x8x96xf32> to vector<2x8x8xf32>
    %57 = tpu.concatenate %53, %54, %55, %56 in 0 : vector<2x8x8xf32>, vector<2x8x8xf32>, vector<2x8x8xf32>, vector<2x8x8xf32> -> vector<8x8x8xf32>
    %58 = vector.extract_strided_slice %47 {offsets = [0, 0, 64], sizes = [2, 8, 8], strides = [1, 1, 1]} : vector<2x8x96xf32> to vector<2x8x8xf32>
    %59 = vector.extract_strided_slice %47 {offsets = [0, 0, 72], sizes = [2, 8, 8], strides = [1, 1, 1]} : vector<2x8x96xf32> to vector<2x8x8xf32>
    %60 = vector.extract_strided_slice %47 {offsets = [0, 0, 80], sizes = [2, 8, 8], strides = [1, 1, 1]} : vector<2x8x96xf32> to vector<2x8x8xf32>
    %61 = vector.extract_strided_slice %47 {offsets = [0, 0, 88], sizes = [2, 8, 8], strides = [1, 1, 1]} : vector<2x8x96xf32> to vector<2x8x8xf32>
    %62 = tpu.concatenate %58, %59, %60, %61 in 0 : vector<2x8x8xf32>, vector<2x8x8xf32>, vector<2x8x8xf32>, vector<2x8x8xf32> -> vector<8x8x8xf32>
    "tpu.trace_start"() <{level = 10 : i32, message = "gqe,gke->gqk"}> : () -> ()
    %cst_21 = arith.constant dense<0.000000e+00> : vector<8x8x8xf32>
    %63 = tpu.matmul %52, %57, %cst_21 {dimension_numbers = #tpu.dot_dimension_numbers<[2], [2], [1], [1], [0, 0, 0, 1, 1, 1], [0], [0]>} : vector<8x8x8xf32>, vector<8x8x8xf32>, vector<8x8x8xf32> -> vector<8x8x8xf32>
    "tpu.trace_stop"() : () -> ()
    %cst_22 = arith.constant 0.353553385 : f32
    %64 = vector.broadcast %cst_22 : f32 to vector<8x8x8xf32>
    %65 = arith.mulf %63, %64 : vector<8x8x8xf32>
    %66 = vector.broadcast %5 : vector<8x1x8xf32> to vector<8x8x8xf32>
    %67 = arith.addf %65, %66 : vector<8x8x8xf32>
    %cst_23 = arith.constant dense<0xFF800000> : vector<8x8xf32>
    %68 = vector.multi_reduction <maximumf>, %67, %cst_23 [2] : vector<8x8x8xf32> to vector<8x8xf32>
    %69 = vector.shape_cast %68 : vector<8x8xf32> to vector<8x8x1xf32>
    %70 = vector.broadcast %69 : vector<8x8x1xf32> to vector<8x8x8xf32>
    %71 = arith.subf %67, %70 : vector<8x8x8xf32>
    %72 = math.exp %71 : vector<8x8x8xf32>
    %cst_24 = arith.constant dense<0.000000e+00> : vector<8x8xf32>
    %73 = vector.multi_reduction <add>, %72, %cst_24 [2] : vector<8x8x8xf32> to vector<8x8xf32>
    %74 = vector.shape_cast %73 : vector<8x8xf32> to vector<8x8x1xf32>
    %75 = tpu.reciprocal %74 {approx = true} : vector<8x8x1xf32> -> vector<8x8x1xf32>
    %76 = vector.broadcast %75 : vector<8x8x1xf32> to vector<8x8x8xf32>
    %77 = arith.mulf %72, %76 : vector<8x8x8xf32>
    "tpu.trace_start"() <{level = 10 : i32, message = "gqk,gke->gqe"}> : () -> ()
    %cst_25 = arith.constant dense<0.000000e+00> : vector<8x8x8xf32>
    %78 = tpu.matmul %77, %62, %cst_25 {dimension_numbers = #tpu.dot_dimension_numbers<[2], [1], [1], [2], [0, 0, 0, 1, 1, 2], [0], [0]>} : vector<8x8x8xf32>, vector<8x8x8xf32>, vector<8x8x8xf32> -> vector<8x8x8xf32>
    "tpu.trace_stop"() : () -> ()
    %79 = vector.extract_strided_slice %78 {offsets = [0, 0, 0], sizes = [2, 8, 8], strides = [1, 1, 1]} : vector<8x8x8xf32> to vector<2x8x8xf32>
    %80 = vector.extract_strided_slice %78 {offsets = [2, 0, 0], sizes = [2, 8, 8], strides = [1, 1, 1]} : vector<8x8x8xf32> to vector<2x8x8xf32>
    %81 = vector.extract_strided_slice %78 {offsets = [4, 0, 0], sizes = [2, 8, 8], strides = [1, 1, 1]} : vector<8x8x8xf32> to vector<2x8x8xf32>
    %82 = vector.extract_strided_slice %78 {offsets = [6, 0, 0], sizes = [2, 8, 8], strides = [1, 1, 1]} : vector<8x8x8xf32> to vector<2x8x8xf32>
    %83 = tpu.concatenate %79, %80, %81, %82 in 2 : vector<2x8x8xf32>, vector<2x8x8xf32>, vector<2x8x8xf32>, vector<2x8x8xf32> -> vector<2x8x32xf32>
    %84 = vector.shape_cast %83 : vector<2x8x32xf32> to vector<16x32xf32>
    %c0_26 = arith.constant 0 : index
    %c0_27 = arith.constant 0 : index
    %c0_28 = arith.constant 0 : index
    %85 = vector.load %arg4[%c0_26, %c0_27, %c0_28] : memref<2x32x32xf32, #tpu.memory_space<vmem>>, vector<1x32x32xf32>
    %86 = vector.shape_cast %85 : vector<1x32x32xf32> to vector<32x32xf32>
    %cst_29 = arith.constant dense<0.000000e+00> : vector<16x32xf32>
    %87 = tpu.matmul %84, %86, %cst_29 {dimension_numbers = #tpu.dot_dimension_numbers<[1], [0], [0], [1], [0, 0, 1, 1], [], []>} : vector<16x32xf32>, vector<32x32xf32>, vector<16x32xf32> -> vector<16x32xf32>
    %88 = arith.addf %0, %87 : vector<16x32xf32>
    %89 = vector.broadcast %9 : vector<1x32xf32> to vector<16x32xf32>
    %90 = arith.addf %88, %89 : vector<16x32xf32>
    %cst_30 = arith.constant dense<0.000000e+00> : vector<16xf32>
    %91 = vector.multi_reduction <add>, %90, %cst_30 [1] : vector<16x32xf32> to vector<16xf32>
    %92 = vector.shape_cast %91 : vector<16xf32> to vector<16x1xf32>
    %cst_31 = arith.constant 3.125000e-02 : f32
    %93 = vector.broadcast %cst_31 : f32 to vector<16x1xf32>
    %94 = arith.mulf %92, %93 : vector<16x1xf32>
    %95 = vector.broadcast %94 : vector<16x1xf32> to vector<16x32xf32>
    %96 = arith.subf %90, %95 : vector<16x32xf32>
    %97 = arith.mulf %96, %96 : vector<16x32xf32>
    %cst_32 = arith.constant dense<0.000000e+00> : vector<16xf32>
    %98 = vector.multi_reduction <add>, %97, %cst_32 [1] : vector<16x32xf32> to vector<16xf32>
    %99 = vector.shape_cast %98 : vector<16xf32> to vector<16x1xf32>
    %cst_33 = arith.constant 0.0322580636 : f32
    %100 = vector.broadcast %cst_33 : f32 to vector<16x1xf32>
    %101 = arith.mulf %99, %100 : vector<16x1xf32>
    %102 = vector.broadcast %19 : vector<1x32xf32> to vector<16x32xf32>
    %103 = arith.mulf %102, %96 : vector<16x32xf32>
    %cst_34 = arith.constant 1.000000e-32 : f32
    %104 = vector.broadcast %cst_34 : f32 to vector<16x1xf32>
    %105 = arith.addf %101, %104 : vector<16x1xf32>
    %106 = math.rsqrt %105 : vector<16x1xf32>
    %107 = vector.broadcast %106 : vector<16x1xf32> to vector<16x32xf32>
    %108 = arith.mulf %103, %107 : vector<16x32xf32>
    %109 = vector.broadcast %21 : vector<1x32xf32> to vector<16x32xf32>
    %110 = arith.addf %108, %109 : vector<16x32xf32>
    %c0_35 = arith.constant 0 : index
    %c0_36 = arith.constant 0 : index
    %c0_37 = arith.constant 0 : index
    %111 = vector.load %arg5[%c0_35, %c0_36, %c0_37] : memref<2x32x64xf32, #tpu.memory_space<vmem>>, vector<1x32x64xf32>
    %112 = vector.shape_cast %111 : vector<1x32x64xf32> to vector<32x64xf32>
    %cst_38 = arith.constant dense<0.000000e+00> : vector<16x64xf32>
    %113 = tpu.matmul %110, %112, %cst_38 {dimension_numbers = #tpu.dot_dimension_numbers<[1], [0], [0], [1], [0, 0, 1, 1], [], []>} : vector<16x32xf32>, vector<32x64xf32>, vector<16x64xf32> -> vector<16x64xf32>
    %114 = vector.broadcast %11 : vector<1x64xf32> to vector<16x64xf32>
    %115 = arith.addf %113, %114 : vector<16x64xf32>
    %cst_39 = arith.constant 0.000000e+00 : f32
    %116 = vector.broadcast %cst_39 : f32 to vector<16x64xf32>
    %117 = arith.maximumf %115, %116 : vector<16x64xf32>
    %c0_40 = arith.constant 0 : index
    %c0_41 = arith.constant 0 : index
    %c0_42 = arith.constant 0 : index
    %118 = vector.load %arg6[%c0_40, %c0_41, %c0_42] : memref<2x64x32xf32, #tpu.memory_space<vmem>>, vector<1x64x32xf32>
    %119 = vector.shape_cast %118 : vector<1x64x32xf32> to vector<64x32xf32>
    %cst_43 = arith.constant dense<0.000000e+00> : vector<16x32xf32>
    %120 = tpu.matmul %117, %119, %cst_43 {dimension_numbers = #tpu.dot_dimension_numbers<[1], [0], [0], [1], [0, 0, 1, 1], [], []>} : vector<16x64xf32>, vector<64x32xf32>, vector<16x32xf32> -> vector<16x32xf32>
    %121 = arith.addf %90, %120 : vector<16x32xf32>
    %122 = vector.broadcast %13 : vector<1x32xf32> to vector<16x32xf32>
    %123 = arith.addf %121, %122 : vector<16x32xf32>
    %c8 = arith.constant 8 : index
    %c0_44 = arith.constant 0 : index
    %124 = vector.load %arg7[%c8, %c0_44] : memref<18x128xf32, #tpu.memory_space<vmem>>, vector<1x128xf32>
    %125 = vector.extract_strided_slice %124 {offsets = [0, 0], sizes = [1, 96], strides = [1, 1]} : vector<1x128xf32> to vector<1x96xf32>
    %c9 = arith.constant 9 : index
    %c0_45 = arith.constant 0 : index
    %126 = vector.load %arg7[%c9, %c0_45] : memref<18x128xf32, #tpu.memory_space<vmem>>, vector<1x128xf32>
    %127 = vector.extract_strided_slice %126 {offsets = [0, 0], sizes = [1, 32], strides = [1, 1]} : vector<1x128xf32> to vector<1x32xf32>
    %c10 = arith.constant 10 : index
    %c0_46 = arith.constant 0 : index
    %128 = vector.load %arg7[%c10, %c0_46] : memref<18x128xf32, #tpu.memory_space<vmem>>, vector<1x128xf32>
    %129 = vector.extract_strided_slice %128 {offsets = [0, 0], sizes = [1, 64], strides = [1, 1]} : vector<1x128xf32> to vector<1x64xf32>
    %c11 = arith.constant 11 : index
    %c0_47 = arith.constant 0 : index
    %130 = vector.load %arg7[%c11, %c0_47] : memref<18x128xf32, #tpu.memory_space<vmem>>, vector<1x128xf32>
    %131 = vector.extract_strided_slice %130 {offsets = [0, 0], sizes = [1, 32], strides = [1, 1]} : vector<1x128xf32> to vector<1x32xf32>
    %c12 = arith.constant 12 : index
    %c0_48 = arith.constant 0 : index
    %132 = vector.load %arg7[%c12, %c0_48] : memref<18x128xf32, #tpu.memory_space<vmem>>, vector<1x128xf32>
    %133 = vector.extract_strided_slice %132 {offsets = [0, 0], sizes = [1, 32], strides = [1, 1]} : vector<1x128xf32> to vector<1x32xf32>
    %c13 = arith.constant 13 : index
    %c0_49 = arith.constant 0 : index
    %134 = vector.load %arg7[%c13, %c0_49] : memref<18x128xf32, #tpu.memory_space<vmem>>, vector<1x128xf32>
    %135 = vector.extract_strided_slice %134 {offsets = [0, 0], sizes = [1, 32], strides = [1, 1]} : vector<1x128xf32> to vector<1x32xf32>
    %c14 = arith.constant 14 : index
    %c0_50 = arith.constant 0 : index
    %136 = vector.load %arg7[%c14, %c0_50] : memref<18x128xf32, #tpu.memory_space<vmem>>, vector<1x128xf32>
    %137 = vector.extract_strided_slice %136 {offsets = [0, 0], sizes = [1, 32], strides = [1, 1]} : vector<1x128xf32> to vector<1x32xf32>
    %c15 = arith.constant 15 : index
    %c0_51 = arith.constant 0 : index
    %138 = vector.load %arg7[%c15, %c0_51] : memref<18x128xf32, #tpu.memory_space<vmem>>, vector<1x128xf32>
    %139 = vector.extract_strided_slice %138 {offsets = [0, 0], sizes = [1, 32], strides = [1, 1]} : vector<1x128xf32> to vector<1x32xf32>
    %cst_52 = arith.constant dense<0.000000e+00> : vector<16xf32>
    %140 = vector.multi_reduction <add>, %123, %cst_52 [1] : vector<16x32xf32> to vector<16xf32>
    %141 = vector.shape_cast %140 : vector<16xf32> to vector<16x1xf32>
    %cst_53 = arith.constant 3.125000e-02 : f32
    %142 = vector.broadcast %cst_53 : f32 to vector<16x1xf32>
    %143 = arith.mulf %141, %142 : vector<16x1xf32>
    %144 = vector.broadcast %143 : vector<16x1xf32> to vector<16x32xf32>
    %145 = arith.subf %123, %144 : vector<16x32xf32>
    %146 = arith.mulf %145, %145 : vector<16x32xf32>
    %cst_54 = arith.constant dense<0.000000e+00> : vector<16xf32>
    %147 = vector.multi_reduction <add>, %146, %cst_54 [1] : vector<16x32xf32> to vector<16xf32>
    %148 = vector.shape_cast %147 : vector<16xf32> to vector<16x1xf32>
    %cst_55 = arith.constant 0.0322580636 : f32
    %149 = vector.broadcast %cst_55 : f32 to vector<16x1xf32>
    %150 = arith.mulf %148, %149 : vector<16x1xf32>
    %151 = vector.broadcast %133 : vector<1x32xf32> to vector<16x32xf32>
    %152 = arith.mulf %151, %145 : vector<16x32xf32>
    %cst_56 = arith.constant 1.000000e-32 : f32
    %153 = vector.broadcast %cst_56 : f32 to vector<16x1xf32>
    %154 = arith.addf %150, %153 : vector<16x1xf32>
    %155 = math.rsqrt %154 : vector<16x1xf32>
    %156 = vector.broadcast %155 : vector<16x1xf32> to vector<16x32xf32>
    %157 = arith.mulf %152, %156 : vector<16x32xf32>
    %158 = vector.broadcast %135 : vector<1x32xf32> to vector<16x32xf32>
    %159 = arith.addf %157, %158 : vector<16x32xf32>
    %c1_57 = arith.constant 1 : index
    %c0_58 = arith.constant 0 : index
    %c0_59 = arith.constant 0 : index
    %160 = vector.load %arg3[%c1_57, %c0_58, %c0_59] : memref<2x32x96xf32, #tpu.memory_space<vmem>>, vector<1x32x96xf32>
    %161 = vector.shape_cast %160 : vector<1x32x96xf32> to vector<32x96xf32>
    %cst_60 = arith.constant dense<0.000000e+00> : vector<16x96xf32>
    %162 = tpu.matmul %159, %161, %cst_60 {dimension_numbers = #tpu.dot_dimension_numbers<[1], [0], [0], [1], [0, 0, 1, 1], [], []>} : vector<16x32xf32>, vector<32x96xf32>, vector<16x96xf32> -> vector<16x96xf32>
    %163 = vector.broadcast %125 : vector<1x96xf32> to vector<16x96xf32>
    %164 = arith.addf %162, %163 : vector<16x96xf32>
    %165 = vector.shape_cast %164 : vector<16x96xf32> to vector<2x8x96xf32>
    %166 = vector.extract_strided_slice %165 {offsets = [0, 0, 0], sizes = [2, 8, 8], strides = [1, 1, 1]} : vector<2x8x96xf32> to vector<2x8x8xf32>
    %167 = vector.extract_strided_slice %165 {offsets = [0, 0, 8], sizes = [2, 8, 8], strides = [1, 1, 1]} : vector<2x8x96xf32> to vector<2x8x8xf32>
    %168 = vector.extract_strided_slice %165 {offsets = [0, 0, 16], sizes = [2, 8, 8], strides = [1, 1, 1]} : vector<2x8x96xf32> to vector<2x8x8xf32>
    %169 = vector.extract_strided_slice %165 {offsets = [0, 0, 24], sizes = [2, 8, 8], strides = [1, 1, 1]} : vector<2x8x96xf32> to vector<2x8x8xf32>
    %170 = tpu.concatenate %166, %167, %168, %169 in 0 : vector<2x8x8xf32>, vector<2x8x8xf32>, vector<2x8x8xf32>, vector<2x8x8xf32> -> vector<8x8x8xf32>
    %171 = vector.extract_strided_slice %165 {offsets = [0, 0, 32], sizes = [2, 8, 8], strides = [1, 1, 1]} : vector<2x8x96xf32> to vector<2x8x8xf32>
    %172 = vector.extract_strided_slice %165 {offsets = [0, 0, 40], sizes = [2, 8, 8], strides = [1, 1, 1]} : vector<2x8x96xf32> to vector<2x8x8xf32>
    %173 = vector.extract_strided_slice %165 {offsets = [0, 0, 48], sizes = [2, 8, 8], strides = [1, 1, 1]} : vector<2x8x96xf32> to vector<2x8x8xf32>
    %174 = vector.extract_strided_slice %165 {offsets = [0, 0, 56], sizes = [2, 8, 8], strides = [1, 1, 1]} : vector<2x8x96xf32> to vector<2x8x8xf32>
    %175 = tpu.concatenate %171, %172, %173, %174 in 0 : vector<2x8x8xf32>, vector<2x8x8xf32>, vector<2x8x8xf32>, vector<2x8x8xf32> -> vector<8x8x8xf32>
    %176 = vector.extract_strided_slice %165 {offsets = [0, 0, 64], sizes = [2, 8, 8], strides = [1, 1, 1]} : vector<2x8x96xf32> to vector<2x8x8xf32>
    %177 = vector.extract_strided_slice %165 {offsets = [0, 0, 72], sizes = [2, 8, 8], strides = [1, 1, 1]} : vector<2x8x96xf32> to vector<2x8x8xf32>
    %178 = vector.extract_strided_slice %165 {offsets = [0, 0, 80], sizes = [2, 8, 8], strides = [1, 1, 1]} : vector<2x8x96xf32> to vector<2x8x8xf32>
    %179 = vector.extract_strided_slice %165 {offsets = [0, 0, 88], sizes = [2, 8, 8], strides = [1, 1, 1]} : vector<2x8x96xf32> to vector<2x8x8xf32>
    %180 = tpu.concatenate %176, %177, %178, %179 in 0 : vector<2x8x8xf32>, vector<2x8x8xf32>, vector<2x8x8xf32>, vector<2x8x8xf32> -> vector<8x8x8xf32>
    "tpu.trace_start"() <{level = 10 : i32, message = "gqe,gke->gqk"}> : () -> ()
    %cst_61 = arith.constant dense<0.000000e+00> : vector<8x8x8xf32>
    %181 = tpu.matmul %170, %175, %cst_61 {dimension_numbers = #tpu.dot_dimension_numbers<[2], [2], [1], [1], [0, 0, 0, 1, 1, 1], [0], [0]>} : vector<8x8x8xf32>, vector<8x8x8xf32>, vector<8x8x8xf32> -> vector<8x8x8xf32>
    "tpu.trace_stop"() : () -> ()
    %cst_62 = arith.constant 0.353553385 : f32
    %182 = vector.broadcast %cst_62 : f32 to vector<8x8x8xf32>
    %183 = arith.mulf %181, %182 : vector<8x8x8xf32>
    %184 = vector.broadcast %5 : vector<8x1x8xf32> to vector<8x8x8xf32>
    %185 = arith.addf %183, %184 : vector<8x8x8xf32>
    %cst_63 = arith.constant dense<0xFF800000> : vector<8x8xf32>
    %186 = vector.multi_reduction <maximumf>, %185, %cst_63 [2] : vector<8x8x8xf32> to vector<8x8xf32>
    %187 = vector.shape_cast %186 : vector<8x8xf32> to vector<8x8x1xf32>
    %188 = vector.broadcast %187 : vector<8x8x1xf32> to vector<8x8x8xf32>
    %189 = arith.subf %185, %188 : vector<8x8x8xf32>
    %190 = math.exp %189 : vector<8x8x8xf32>
    %cst_64 = arith.constant dense<0.000000e+00> : vector<8x8xf32>
    %191 = vector.multi_reduction <add>, %190, %cst_64 [2] : vector<8x8x8xf32> to vector<8x8xf32>
    %192 = vector.shape_cast %191 : vector<8x8xf32> to vector<8x8x1xf32>
    %193 = tpu.reciprocal %192 {approx = true} : vector<8x8x1xf32> -> vector<8x8x1xf32>
    %194 = vector.broadcast %193 : vector<8x8x1xf32> to vector<8x8x8xf32>
    %195 = arith.mulf %190, %194 : vector<8x8x8xf32>
    "tpu.trace_start"() <{level = 10 : i32, message = "gqk,gke->gqe"}> : () -> ()
    %cst_65 = arith.constant dense<0.000000e+00> : vector<8x8x8xf32>
    %196 = tpu.matmul %195, %180, %cst_65 {dimension_numbers = #tpu.dot_dimension_numbers<[2], [1], [1], [2], [0, 0, 0, 1, 1, 2], [0], [0]>} : vector<8x8x8xf32>, vector<8x8x8xf32>, vector<8x8x8xf32> -> vector<8x8x8xf32>
    "tpu.trace_stop"() : () -> ()
    %197 = vector.extract_strided_slice %196 {offsets = [0, 0, 0], sizes = [2, 8, 8], strides = [1, 1, 1]} : vector<8x8x8xf32> to vector<2x8x8xf32>
    %198 = vector.extract_strided_slice %196 {offsets = [2, 0, 0], sizes = [2, 8, 8], strides = [1, 1, 1]} : vector<8x8x8xf32> to vector<2x8x8xf32>
    %199 = vector.extract_strided_slice %196 {offsets = [4, 0, 0], sizes = [2, 8, 8], strides = [1, 1, 1]} : vector<8x8x8xf32> to vector<2x8x8xf32>
    %200 = vector.extract_strided_slice %196 {offsets = [6, 0, 0], sizes = [2, 8, 8], strides = [1, 1, 1]} : vector<8x8x8xf32> to vector<2x8x8xf32>
    %201 = tpu.concatenate %197, %198, %199, %200 in 2 : vector<2x8x8xf32>, vector<2x8x8xf32>, vector<2x8x8xf32>, vector<2x8x8xf32> -> vector<2x8x32xf32>
    %202 = vector.shape_cast %201 : vector<2x8x32xf32> to vector<16x32xf32>
    %c1_66 = arith.constant 1 : index
    %c0_67 = arith.constant 0 : index
    %c0_68 = arith.constant 0 : index
    %203 = vector.load %arg4[%c1_66, %c0_67, %c0_68] : memref<2x32x32xf32, #tpu.memory_space<vmem>>, vector<1x32x32xf32>
    %204 = vector.shape_cast %203 : vector<1x32x32xf32> to vector<32x32xf32>
    %cst_69 = arith.constant dense<0.000000e+00> : vector<16x32xf32>
    %205 = tpu.matmul %202, %204, %cst_69 {dimension_numbers = #tpu.dot_dimension_numbers<[1], [0], [0], [1], [0, 0, 1, 1], [], []>} : vector<16x32xf32>, vector<32x32xf32>, vector<16x32xf32> -> vector<16x32xf32>
    %206 = arith.addf %123, %205 : vector<16x32xf32>
    %207 = vector.broadcast %127 : vector<1x32xf32> to vector<16x32xf32>
    %208 = arith.addf %206, %207 : vector<16x32xf32>
    %cst_70 = arith.constant dense<0.000000e+00> : vector<16xf32>
    %209 = vector.multi_reduction <add>, %208, %cst_70 [1] : vector<16x32xf32> to vector<16xf32>
    %210 = vector.shape_cast %209 : vector<16xf32> to vector<16x1xf32>
    %cst_71 = arith.constant 3.125000e-02 : f32
    %211 = vector.broadcast %cst_71 : f32 to vector<16x1xf32>
    %212 = arith.mulf %210, %211 : vector<16x1xf32>
    %213 = vector.broadcast %212 : vector<16x1xf32> to vector<16x32xf32>
    %214 = arith.subf %208, %213 : vector<16x32xf32>
    %215 = arith.mulf %214, %214 : vector<16x32xf32>
    %cst_72 = arith.constant dense<0.000000e+00> : vector<16xf32>
    %216 = vector.multi_reduction <add>, %215, %cst_72 [1] : vector<16x32xf32> to vector<16xf32>
    %217 = vector.shape_cast %216 : vector<16xf32> to vector<16x1xf32>
    %cst_73 = arith.constant 0.0322580636 : f32
    %218 = vector.broadcast %cst_73 : f32 to vector<16x1xf32>
    %219 = arith.mulf %217, %218 : vector<16x1xf32>
    %220 = vector.broadcast %137 : vector<1x32xf32> to vector<16x32xf32>
    %221 = arith.mulf %220, %214 : vector<16x32xf32>
    %cst_74 = arith.constant 1.000000e-32 : f32
    %222 = vector.broadcast %cst_74 : f32 to vector<16x1xf32>
    %223 = arith.addf %219, %222 : vector<16x1xf32>
    %224 = math.rsqrt %223 : vector<16x1xf32>
    %225 = vector.broadcast %224 : vector<16x1xf32> to vector<16x32xf32>
    %226 = arith.mulf %221, %225 : vector<16x32xf32>
    %227 = vector.broadcast %139 : vector<1x32xf32> to vector<16x32xf32>
    %228 = arith.addf %226, %227 : vector<16x32xf32>
    %c1_75 = arith.constant 1 : index
    %c0_76 = arith.constant 0 : index
    %c0_77 = arith.constant 0 : index
    %229 = vector.load %arg5[%c1_75, %c0_76, %c0_77] : memref<2x32x64xf32, #tpu.memory_space<vmem>>, vector<1x32x64xf32>
    %230 = vector.shape_cast %229 : vector<1x32x64xf32> to vector<32x64xf32>
    %cst_78 = arith.constant dense<0.000000e+00> : vector<16x64xf32>
    %231 = tpu.matmul %228, %230, %cst_78 {dimension_numbers = #tpu.dot_dimension_numbers<[1], [0], [0], [1], [0, 0, 1, 1], [], []>} : vector<16x32xf32>, vector<32x64xf32>, vector<16x64xf32> -> vector<16x64xf32>
    %232 = vector.broadcast %129 : vector<1x64xf32> to vector<16x64xf32>
    %233 = arith.addf %231, %232 : vector<16x64xf32>
    %cst_79 = arith.constant 0.000000e+00 : f32
    %234 = vector.broadcast %cst_79 : f32 to vector<16x64xf32>
    %235 = arith.maximumf %233, %234 : vector<16x64xf32>
    %c1_80 = arith.constant 1 : index
    %c0_81 = arith.constant 0 : index
    %c0_82 = arith.constant 0 : index
    %236 = vector.load %arg6[%c1_80, %c0_81, %c0_82] : memref<2x64x32xf32, #tpu.memory_space<vmem>>, vector<1x64x32xf32>
    %237 = vector.shape_cast %236 : vector<1x64x32xf32> to vector<64x32xf32>
    %cst_83 = arith.constant dense<0.000000e+00> : vector<16x32xf32>
    %238 = tpu.matmul %235, %237, %cst_83 {dimension_numbers = #tpu.dot_dimension_numbers<[1], [0], [0], [1], [0, 0, 1, 1], [], []>} : vector<16x64xf32>, vector<64x32xf32>, vector<16x32xf32> -> vector<16x32xf32>
    %239 = arith.addf %208, %238 : vector<16x32xf32>
    %240 = vector.broadcast %131 : vector<1x32xf32> to vector<16x32xf32>
    %241 = arith.addf %239, %240 : vector<16x32xf32>
    %c16 = arith.constant 16 : index
    %c0_84 = arith.constant 0 : index
    %242 = vector.load %arg7[%c16, %c0_84] : memref<18x128xf32, #tpu.memory_space<vmem>>, vector<1x128xf32>
    %243 = vector.extract_strided_slice %242 {offsets = [0, 0], sizes = [1, 32], strides = [1, 1]} : vector<1x128xf32> to vector<1x32xf32>
    %c17 = arith.constant 17 : index
    %c0_85 = arith.constant 0 : index
    %244 = vector.load %arg7[%c17, %c0_85] : memref<18x128xf32, #tpu.memory_space<vmem>>, vector<1x128xf32>
    %245 = vector.extract_strided_slice %244 {offsets = [0, 0], sizes = [1, 32], strides = [1, 1]} : vector<1x128xf32> to vector<1x32xf32>
    %cst_86 = arith.constant dense<0.000000e+00> : vector<16xf32>
    %246 = vector.multi_reduction <add>, %241, %cst_86 [1] : vector<16x32xf32> to vector<16xf32>
    %247 = vector.shape_cast %246 : vector<16xf32> to vector<16x1xf32>
    %cst_87 = arith.constant 3.125000e-02 : f32
    %248 = vector.broadcast %cst_87 : f32 to vector<16x1xf32>
    %249 = arith.mulf %247, %248 : vector<16x1xf32>
    %250 = vector.broadcast %249 : vector<16x1xf32> to vector<16x32xf32>
    %251 = arith.subf %241, %250 : vector<16x32xf32>
    %252 = arith.mulf %251, %251 : vector<16x32xf32>
    %cst_88 = arith.constant dense<0.000000e+00> : vector<16xf32>
    %253 = vector.multi_reduction <add>, %252, %cst_88 [1] : vector<16x32xf32> to vector<16xf32>
    %254 = vector.shape_cast %253 : vector<16xf32> to vector<16x1xf32>
    %cst_89 = arith.constant 0.0322580636 : f32
    %255 = vector.broadcast %cst_89 : f32 to vector<16x1xf32>
    %256 = arith.mulf %254, %255 : vector<16x1xf32>
    %257 = vector.broadcast %243 : vector<1x32xf32> to vector<16x32xf32>
    %258 = arith.mulf %257, %251 : vector<16x32xf32>
    %cst_90 = arith.constant 1.000000e-32 : f32
    %259 = vector.broadcast %cst_90 : f32 to vector<16x1xf32>
    %260 = arith.addf %256, %259 : vector<16x1xf32>
    %261 = math.rsqrt %260 : vector<16x1xf32>
    %262 = vector.broadcast %261 : vector<16x1xf32> to vector<16x32xf32>
    %263 = arith.mulf %258, %262 : vector<16x32xf32>
    %264 = vector.broadcast %245 : vector<1x32xf32> to vector<16x32xf32>
    %265 = arith.addf %263, %264 : vector<16x32xf32>
    %c0_91 = arith.constant 0 : index
    %c0_92 = arith.constant 0 : index
    %266 = vector.load %arg8[%c0_91, %c0_92] : memref<16x32xf32, #tpu.memory_space<vmem>>, vector<16x32xf32>
    tpu.vector_store %arg8[%c0_91, %c0_92], %265 {strides = array<i32>} : memref<16x32xf32, #tpu.memory_space<vmem>>, vector<16x32xf32>,
    return
  }
  func.func @transform_0(%arg0: i32) -> (i32, i32) {
    %c0_i32 = arith.constant 0 : i32
    %c0_i32_0 = arith.constant 0 : i32
    %c0_i32_1 = arith.constant 0 : i32
    return %c0_i32, %c0_i32_0 : i32, i32
  }
  func.func @transform_1(%arg0: i32) -> (i32, i32, i32) {
    %c0_i32 = arith.constant 0 : i32
    %c0_i32_0 = arith.constant 0 : i32
    %c0_i32_1 = arith.constant 0 : i32
    %c0_i32_2 = arith.constant 0 : i32
    return %c0_i32, %c0_i32_0, %c0_i32_1 : i32, i32, i32
  }
  func.func @transform_2(%arg0: i32) -> (i32, i32, i32) {
    %c0_i32 = arith.constant 0 : i32
    %c0_i32_0 = arith.constant 0 : i32
    %c0_i32_1 = arith.constant 0 : i32
    %c0_i32_2 = arith.constant 0 : i32
    return %c0_i32, %c0_i32_0, %c0_i32_1 : i32, i32, i32
  }
  func.func @transform_3(%arg0: i32) -> (i32, i32, i32) {
    %c0_i32 = arith.constant 0 : i32
    %c0_i32_0 = arith.constant 0 : i32
    %c0_i32_1 = arith.constant 0 : i32
    %c0_i32_2 = arith.constant 0 : i32
    return %c0_i32, %c0_i32_0, %c0_i32_1 : i32, i32, i32
  }
  func.func @transform_4(%arg0: i32) -> (i32, i32, i32) {
    %c0_i32 = arith.constant 0 : i32
    %c0_i32_0 = arith.constant 0 : i32
    %c0_i32_1 = arith.constant 0 : i32
    %c0_i32_2 = arith.constant 0 : i32
    return %c0_i32, %c0_i32_0, %c0_i32_1 : i32, i32, i32
  }
  func.func @transform_5(%arg0: i32) -> (i32, i32, i32) {
    %c0_i32 = arith.constant 0 : i32
    %c0_i32_0 = arith.constant 0 : i32
    %c0_i32_1 = arith.constant 0 : i32
    %c0_i32_2 = arith.constant 0 : i32
    return %c0_i32, %c0_i32_0, %c0_i32_1 : i32, i32, i32
  }
  func.func @transform_6(%arg0: i32) -> (i32, i32) {
    %c0_i32 = arith.constant 0 : i32
    %c0_i32_0 = arith.constant 0 : i32
    %c0_i32_1 = arith.constant 0 : i32
    return %c0_i32, %c0_i32_0 : i32, i32
  }
  func.func @transform_7(%arg0: i32) -> (i32, i32) {
    %c0_i32 = arith.constant 0 : i32
    %c0_i32_0 = arith.constant 0 : i32
    %c0_i32_1 = arith.constant 0 : i32
    return %c0_i32, %c0_i32_0 : i32, i32
  }
}

</mosaic_0001>

<bundles_post_ra>
// kernel: tpu_custom_call.1
= control target key start
LH: loop header
LB: loop body
LE: loop exit
PB: predicated region body
PF: predicated region fallthrough
CT: control target
= control target key end

     0   :  { %12 = vsyncpa [#allocation3], 0  ;;  %s5205_s0 = inlined_call_operand.hbm [shape: f32[16,32], index: 0, kind: input, shape index: {}]   ;;  %s5206_s1 = inlined_call_operand.vmem [shape: f32[2,1,8], index: 1, kind: input, shape index: {}]   ;;  %s5207_s2 = inlined_call_operand.vmem [shape: f32[2,32,96], index: 2, kind: input, shape index: {}]   ;;  %s5208_s3 = inlined_call_operand.vmem [shape: f32[2,32,32], index: 3, kind: input, shape index: {}]   ;;  %s5209_s4 = inlined_call_operand.vmem [shape: f32[2,32,64], index: 4, kind: input, shape index: {}]   ;;  %s5210_s5 = inlined_call_operand.vmem [shape: f32[2,64,32], index: 5, kind: input, shape index: {}]   ;;  %s5211_s6 = inlined_call_operand.hbm [shape: f32[18,128], index: 6, kind: input, shape index: {}]   ;;  %s5212_s7 = inlined_call_operand.hbm [shape: f32[16,32], index: 7, kind: output, shape index: {}]  }
   0x1   :  { %13 = vsyncpa [#allocation6], 0 }
   0x2   :  { %14 = vsyncpa [#allocation4], 0  ;;  %s4514_s24 = smov [#allocation2]   ;;  %s4442_s28 = scalar_lea.hbm %s5205_s0, 256 }
   0x3   :  { %s20_s25 = sshll.u32 %s4514_s24, 4  ;;  %p4443_p0 = scmp.ne.s32.totalorder %s5205_s0, %s4442_s28  ;;  %s21_s25 = int_to_ptr.vmem [resolvable:$true] %s20_s25 }
   0x4   :  { %p4446_p1 = scmp.lt.u32.totalorder %s4442_s28, %s5205_s0 }
   0x6   :  { %p4448_p2 = pnand %p4446_p1, %p4443_p0 }
   0x8   :  { %4451 = shalt.err (!%p4448_p2)
}
   0x9   :  { %s4452_s10 = scalar_lea.vmem %s21_s25, 256  ;;  %p4457_p4 = scmp.lt.s32.totalorder %s21_s25, %s21_s25 }
   0xa   :  { %p4453_p3 = scmp.ne.s32.totalorder %s21_s25, %s4452_s10  ;;  %p4458_p5 = scmp.lt.s32.totalorder %s4452_s10, %s4452_s10 }
   0xc   :  { %p4459_p6 = por %p4458_p5, %p4457_p4 }
   0xe   :  { %p4460_p7 = pnand %p4459_p6, %p4453_p3 }
  0x10   :  { %4463 = shalt.err (!%p4460_p7)
}
  0x11   :  { %s4515_s11 = smov 128   ;;  %s4516_s12 = smov 8  }
  0x12   :  { %26 = dma.hbm_to_vmem [thread:$0]  %s5205_s0, 256, %s21_s25, [#allocation3], %s4515_s11, %s4515_s11, %s4516_s12  }
  0x13   :  { %s4517_s15 = smov [#allocation5]   ;;  %s4464_s19 = scalar_lea.hbm %s5211_s6, 384 }
  0x14   :  { %s42_s16 = sshll.u32 %s4517_s15, 4  ;;  %p4465_p8 = scmp.ne.s32.totalorder %s5211_s6, %s4464_s19  ;;  %s43_s16 = int_to_ptr.vmem [resolvable:$true] %s42_s16 }
  0x15   :  { %p4468_p9 = scmp.lt.u32.totalorder %s4464_s19, %s5211_s6 }
  0x17   :  { %p4470_p10 = pnand %p4468_p9, %p4465_p8 }
  0x19   :  { %4473 = shalt.err (!%p4470_p10)
}
  0x1a   :  { %s4474_s24 = scalar_lea.vmem %s43_s16, 384  ;;  %p4479_p12 = scmp.lt.s32.totalorder %s43_s16, %s43_s16 }
  0x1b   :  { %p4475_p11 = scmp.ne.s32.totalorder %s43_s16, %s4474_s24  ;;  %p4480_p13 = scmp.lt.s32.totalorder %s4474_s24, %s4474_s24 }
  0x1d   :  { %p4481_p0 = por %p4480_p13, %p4479_p12 }
  0x1f   :  { %p4482_p1 = pnand %p4481_p0, %p4475_p11 }
  0x21   :  { %4485 = shalt.err (!%p4482_p1)
}
  0x22   :  { %48 = dma.hbm_to_vmem [thread:$0]  %s5211_s6, 384, %s43_s16, [#allocation6], %s4515_s11, %s4515_s11, %s4516_s12  }
  0x23   :  { %4508 = dma.done.wait [#allocation3], 256  }
  0x24   :  { %4509 = vsyncadd [#allocation3], 4294967040 }
  0x25   :  { %4510 = dma.done.wait [#allocation6], 384  }
  0x26   :  { %4511 = vsyncadd [#allocation6], 4294966912  ;;  %vm67_vm0 = vcmask 261120   ;;  %v4598_v0 = vld [vmem:[#allocation2] sm:$0xff]  ;;  %v4600_v1 = vld [vmem:[#allocation2 + $0x8] sm:$0xff]  ;;  %v4518_v37 = vmov 0.0  }
  0x27   :  { %v68_v2 = vsel %vm67_vm0, %v4598_v0, 0.0  ;;  %v71_v3 = vsel %vm67_vm0, %v4600_v1, 0.0  ;;  %v106_v14 = vld [vmem:[%s5207_s2] sm:$0xff]  ;;  %v107_v15 = vld [vmem:[%s5207_s2 + $0x8] sm:$0xff]  ;;  %v108_v16 = vld [vmem:[%s5207_s2 + $0x10] sm:$0xff]  ;;  %4021 = vmatprep.subr.mxu0 %v4518_v37  ;;  %vm4519_vm1 = vmmov 0  }
  0x28   :  { %69 = vadd.xlane.f32.xlu0 %v68_v2  ;;  %v4264_v17 = vpack.c.bf16 %v107_v15, %v106_v14  ;;  %v109_v18 = vld [vmem:[%s5207_s2 + $0x18] sm:$0xff]  ;;  %v3776_v26 = vld [vmem:[#allocation5 + $0x4] ss:$0 sm:$0xff]  ;;  %v3777_v29 = vld [vmem:[#allocation5 + $0x5] ss:$0 sm:$0xff]  ;;  %4023 = vmatprep.mubr.msk.f32.mxu0 %vm4519_vm1, %v4518_v37  ;;  %s4520_s10 = smov 120  }
  0x29   :  { %v4268_v19 = vpack.c.bf16 %v109_v18, %v108_v16  ;;  %v3778_v36 = vld [vmem:[#allocation5] ss:$0 sm:$0xff]  ;;  %s4521_s13 = smov 112   ;;  %s4522_s14 = smov 104   ;;  %vm211_vm2 = vcmask 64512   ;;  %vm1568_vm3 = vcmask 130048  }
  0x2a   :  { %4265 = vmatprep.subr.bf16.mxu1 %v4264_v17  ;;  %s4523_s15 = smov 96   ;;  %v4725_v57 = vld [vmem:[%s5206_s1] ss:$0 sm:$0xff]  ;;  %v4732_v63 = vld [vmem:[%s5206_s1 + $0x1] ss:$0 sm:$0xff]  ;;  %s4524_s1 = smov 64  }
  0x2b   :  { %4267 = vmatpush3.bf16.msra.mxu1 %v4264_v17  ;;  %s4525_s26 = smov 16   ;;  %s4526_s27 = smov 24   ;;  %vm1571_vm4 = vcmask 195584   ;;  %vm1804_vm5 = vcmask 523264  }
  0x2c   :  { %72 = vadd.xlane.f32.xlu0 %v71_v3  ;;  %4269 = vmatprep.subr.bf16.mxu1 %v4268_v19 }
  0x2f   :  { %4271 = vmatpush3.bf16.msra.mxu1 %v4268_v19 }
  0x30   :  { %4011 = vmatprep.subr.mxu1 %v4518_v37 }
  0xb5   :  { %v70_v4 = vpop.xlane.xlu0 %69 }
  0xb6   :  { %v74_v5 = vmul.f32 0.03125, %v70_v4 }
  0xb8   :  { %v76_v6 = vsub.f32 %v4598_v0, %v74_v5 }
  0xb9   :  { %v73_v7 = vpop.xlane.xlu0 %72 }
  0xba   :  { %v75_v8 = vmul.f32 0.03125, %v73_v7  ;;  %v78_v9 = vmul.f32 %v76_v6, %v76_v6  ;;  %v92_v27 = vmul.f32 %v3776_v26, %v76_v6 }
  0xbc   :  { %v77_v10 = vsub.f32 %v4600_v1, %v75_v8  ;;  %v80_v11 = vsel %vm67_vm0, %v78_v9, 0.0 }
  0xbd   :  { %81 = vadd.xlane.f32.xlu1 %v80_v11 }
  0xbe   :  { %v79_v12 = vmul.f32 %v77_v10, %v77_v10  ;;  %v93_v31 = vmul.f32 %v3776_v26, %v77_v10 }
  0xc0   :  { %v83_v13 = vsel %vm67_vm0, %v79_v12, 0.0 }
  0xc1   :  { %84 = vadd.xlane.f32.xlu1 %v83_v13 }
 0x14a   :  { %v82_v20 = vpop.xlane.xlu1 %81 }
 0x14b   :  { %v86_v21 = vmul.f32 0.032258064, %v82_v20 }
 0x14d   :  { %v94_v22 = vadd.f32 1e-32, %v86_v21 }
 0x14e   :  { %v85_v23 = vpop.xlane.xlu1 %84 }
 0x14f   :  { %4358 = vrsqrt.f32 %v94_v22  ;;  %v87_v24 = vmul.f32 0.032258064, %v85_v23 }
 0x151   :  { %v95_v25 = vadd.f32 1e-32, %v87_v24 }
 0x153   :  { %4360 = vrsqrt.f32 %v95_v25 }
 0x159   :  { %v4359_v28 = vpop.eup %4358 }
 0x15a   :  { %v98_v30 = vmul.f32 %v4359_v28, %v92_v27 }
 0x15c   :  { %v104_v32 = vadd.f32 %v3777_v29, %v98_v30 }
 0x15d   :  { %v4361_v33 = vpop.eup %4360 }
 0x15e   :  { %v99_v34 = vmul.f32 %v4361_v33, %v93_v31  ;;  %4008 = vmatprep.mubr.msk.f32.mxu1 %vm67_vm0, %v104_v32 }
 0x160   :  { %v105_v35 = vadd.f32 %v3777_v29, %v99_v34 }
 0x162   :  { %4009 = vmatmul.mubr.msk.f32.vlgmr.msra.gmra.mrb[0].mxu1 %vm67_vm0, %v105_v35 }
 0x163   :  { %4013 = vmatprep.mubr.msk.f32.mxu1 %vm4519_vm1, %v4518_v37 }
 0x235   :  { %v4010_v38 = vpop.f32.mrb[0].mxu1 }
 0x236   :  { %v4630_v39 = vadd.f32 %v4010_v38, %v3778_v36  ;;  %v186_v40 = vpop.f32.mrb[1].mxu1 }
 0x237   :  { %v4632_v41 = vadd.f32 %v3778_v36, %v186_v40 }
 0x238   :  { %199 = vrot.lane.b32.xlu1 %v4630_v39, %s4520_s10 }
 0x239   :  { %197 = vrot.lane.b32.xlu0 %v4632_v41, %s4520_s10 }
 0x23c   :  { %201 = vrot.lane.b32.xlu1 %v4632_v41, %s4521_s13 }
 0x23d   :  { %205 = vrot.lane.b32.xlu0 %v4632_v41, %s4522_s14 }
 0x240   :  { %203 = vrot.lane.b32.xlu1 %v4630_v39, %s4521_s13 }
 0x241   :  { %209 = vrot.lane.b32.xlu0 %v4632_v41, %s4523_s15 }
 0x244   :  { %207 = vrot.lane.b32.xlu1 %v4630_v39, %s4522_s14 }
 0x248   :  { %286 = vrot.lane.b32.xlu1 %v4630_v39, %s4523_s15 }
 0x2aa   :  { %v4650_v42 = vpop.permute.xlu1 %199 }
 0x2ab   :  { %438 = vrot.lane.b32.xlu1 %v4650_v42, %s4523_s15  ;;  %v4654_v43 = vpop.permute.xlu0 %197 }
 0x2ac   :  { %362 = vrot.lane.b32.xlu0 %v4654_v43, %s4523_s15 }
 0x2ae   :  { %v4658_v44 = vpop.permute.xlu1 %201 }
 0x2af   :  { %v4660_v45 = vpop.permute.xlu0 %205 }
 0x2b0   :  { %514 = vrot.lane.b32.xlu0 %v4658_v44, %s4523_s15 }
 0x2b2   :  { %v4664_v46 = vpop.permute.xlu1 %203 }
 0x2b3   :  { %590 = vrot.lane.b32.xlu1 %v4664_v46, %s4523_s15  ;;  %v210_v47 = vpop.permute.xlu0 %209 }
 0x2b4   :  { %666 = vrot.lane.b32.xlu0 %v4660_v45, %s4523_s15  ;;  %4012 = vmatpush3.xpose.msk.msra.mxu1 %vm211_vm2, %v210_v47 }
 0x2b5   :  { %4016 = vmatprep.subr.mxu1 %v4518_v37 }
 0x2b6   :  { %v4672_v48 = vpop.permute.xlu1 %207 }
 0x2b7   :  { %742 = vrot.lane.b32.xlu1 %v4672_v48, %s4523_s15  ;;  %4014 = vmatmul.mubr.msk.f32.vlgmr.msra.gmra.mrb[2].mxu1 %vm211_vm2, %v4632_v41 }
 0x2b8   :  { %4018 = vmatprep.mubr.msk.f32.mxu1 %vm4519_vm1, %v4518_v37 }
 0x2ba   :  { %v287_v49 = vpop.permute.xlu1 %286 }
 0x2bb   :  { %4017 = vmatpush3.xpose.msk.msra.mxu1 %vm211_vm2, %v287_v49 }
 0x2bc   :  { %4026 = vmatprep.subr.mxu1 %v4518_v37 }
 0x2be   :  { %4019 = vmatmul.mubr.msk.f32.vlgmr.msra.gmra.mrb[4].mxu1 %vm211_vm2, %v4630_v39 }
 0x2bf   :  { %4028 = vmatprep.mubr.msk.f32.mxu1 %vm4519_vm1, %v4518_v37 }
 0x31d   :  { %v439_v50 = vpop.permute.xlu1 %438 }
 0x31e   :  { %4027 = vmatpush3.xpose.msk.msra.mxu1 %vm211_vm2, %v439_v50  ;;  %v363_v51 = vpop.permute.xlu0 %362 }
 0x31f   :  { %4022 = vmatpush3.xpose.msk.msra.mxu0 %vm211_vm2, %v363_v51  ;;  %4036 = vmatprep.subr.mxu1 %v4518_v37 }
 0x320   :  { %4031 = vmatprep.subr.mxu0 %v4518_v37 }
 0x321   :  { %4029 = vmatmul.mubr.msk.f32.vlgmr.msra.gmra.mrb[6].mxu1 %vm211_vm2, %v4650_v42 }
 0x322   :  { %4024 = vmatmul.mubr.msk.f32.vlgmr.msra.gmra.mrb[0].mxu0 %vm211_vm2, %v4654_v43  ;;  %v515_v52 = vpop.permute.xlu0 %514  ;;  %4038 = vmatprep.mubr.msk.f32.mxu1 %vm4519_vm1, %v4518_v37 }
 0x323   :  { %4032 = vmatpush3.xpose.msk.msra.mxu0 %vm211_vm2, %v515_v52  ;;  %4033 = vmatprep.mubr.msk.f32.mxu0 %vm4519_vm1, %v4518_v37 }
 0x324   :  { %4041 = vmatprep.subr.mxu0 %v4518_v37 }
 0x325   :  { %v591_v53 = vpop.permute.xlu1 %590 }
 0x326   :  { %4034 = vmatmul.mubr.msk.f32.vlgmr.msra.gmra.mrb[2].mxu0 %vm211_vm2, %v4658_v44  ;;  %4037 = vmatpush3.xpose.msk.msra.mxu1 %vm211_vm2, %v591_v53  ;;  %v667_v54 = vpop.permute.xlu0 %666 }
 0x327   :  { %4042 = vmatpush3.xpose.msk.msra.mxu0 %vm211_vm2, %v667_v54  ;;  %4043 = vmatprep.mubr.msk.f32.mxu0 %vm4519_vm1, %v4518_v37 }
 0x328   :  { %4046 = vmatprep.subr.mxu1 %v4518_v37  ;;  %4051 = vmatprep.subr.mxu0 %v4518_v37 }
 0x329   :  { %v743_v55 = vpop.permute.xlu1 %742  ;;  %4039 = vmatmul.mubr.msk.f32.vlgmr.msra.gmra.mrb[8].mxu1 %vm211_vm2, %v4664_v46 }
 0x32a   :  { %4044 = vmatmul.mubr.msk.f32.vlgmr.msra.gmra.mrb[4].mxu0 %vm211_vm2, %v4660_v45  ;;  %4047 = vmatpush3.xpose.msk.msra.mxu1 %vm211_vm2, %v743_v55 }
 0x32b   :  { %4048 = vmatprep.mubr.msk.f32.mxu1 %vm4519_vm1, %v4518_v37  ;;  %4056 = vmatprep.subr.mxu1 %v4518_v37 }
 0x32c   :  { %4053 = vmatprep.mubr.msk.f32.mxu0 %vm4519_vm1, %v4518_v37 }
 0x32d   :  { %4049 = vmatmul.mubr.msk.f32.vlgmr.msra.gmra.mrb[10].mxu1 %vm211_vm2, %v4672_v48 }
 0x32e   :  { %4058 = vmatprep.mubr.msk.f32.mxu1 %vm4519_vm1, %v4518_v37 }
 0x38a   :  { %v282_v56 = vpop.f32.mrb[2].mxu1 }
 0x38b   :  { %v818_v58 = vmul.f32 0.35355338, %v282_v56  ;;  %v4015_v59 = vpop.f32.mrb[3].mxu1 }
 0x38d   :  { %v838_v60 = vadd.f32 %v4725_v57, %v818_v58 }
 0x38f   :  { %v846_v61 = vsel %vm211_vm2, %v838_v60, -inf }
 0x390   :  { %847 = vmax.xlane.f32.xlu0 %v846_v61 }
 0x391   :  { %v358_v62 = vpop.f32.mrb[4].mxu1 }
 0x392   :  { %v819_v2 = vmul.f32 0.35355338, %v358_v62  ;;  %v4020_v3 = vpop.f32.mrb[5].mxu1 }
 0x394   :  { %v839_v4 = vadd.f32 %v4732_v63, %v819_v2 }
 0x396   :  { %v849_v5 = vsel %vm211_vm2, %v839_v4, -inf }
 0x397   :  { %850 = vmax.xlane.f32.xlu1 %v849_v5 }
 0x3f4   :  { %v510_v6 = vpop.f32.mrb[6].mxu1 }
 0x3f5   :  { %v821_v7 = vmul.f32 0.35355338, %v510_v6  ;;  %v434_v8 = vpop.f32.mrb[0].mxu0  ;;  %v4030_v9 = vpop.f32.mrb[7].mxu1 }
 0x3f6   :  { %v820_v10 = vmul.f32 0.35355338, %v434_v8  ;;  %v4025_v11 = vpop.f32.mrb[1].mxu0 }
 0x3f7   :  { %v841_v12 = vadd.f32 %v4732_v63, %v821_v7 }
 0x3f8   :  { %v840_v15 = vadd.f32 %v4725_v57, %v820_v10 }
 0x3f9   :  { %v586_v13 = vpop.f32.mrb[2].mxu0  ;;  %v855_v14 = vsel %vm211_vm2, %v841_v12, -inf }
 0x3fa   :  { %v822_v16 = vmul.f32 0.35355338, %v586_v13  ;;  %856 = vmax.xlane.f32.xlu0 %v855_v14  ;;  %v4035_v17 = vpop.f32.mrb[3].mxu0  ;;  %v852_v22 = vsel %vm211_vm2, %v840_v15, -inf }
 0x3fc   :  { %v662_v18 = vpop.f32.mrb[8].mxu1  ;;  %v842_v23 = vadd.f32 %v4725_v57, %v822_v16 }
 0x3fd   :  { %v823_v19 = vmul.f32 0.35355338, %v662_v18  ;;  %v4040_v20 = vpop.f32.mrb[9].mxu1  ;;  %v738_v21 = vpop.f32.mrb[4].mxu0 }
 0x3fe   :  { %v824_v24 = vmul.f32 0.35355338, %v738_v21  ;;  %853 = vmax.xlane.f32.xlu0 %v852_v22  ;;  %v4045_v25 = vpop.f32.mrb[5].mxu0  ;;  %v858_v31 = vsel %vm211_vm2, %v842_v23, -inf }
 0x3ff   :  { %v843_v26 = vadd.f32 %v4732_v63, %v823_v19 }
 0x400   :  { %v814_v27 = vpop.f32.mrb[10].mxu1  ;;  %v844_v32 = vadd.f32 %v4725_v57, %v824_v24 }
 0x401   :  { %v825_v28 = vmul.f32 0.35355338, %v814_v27  ;;  %v4050_v29 = vpop.f32.mrb[11].mxu1  ;;  %v861_v30 = vsel %vm211_vm2, %v843_v26, -inf }
 0x402   :  { %862 = vmax.xlane.f32.xlu1 %v861_v30  ;;  %859 = vmax.xlane.f32.xlu0 %v858_v31  ;;  %v864_v35 = vsel %vm211_vm2, %v844_v32, -inf }
 0x403   :  { %v845_v33 = vadd.f32 %v4732_v63, %v825_v28 }
 0x405   :  { %v867_v34 = vsel %vm211_vm2, %v845_v33, -inf }
 0x406   :  { %868 = vmax.xlane.f32.xlu1 %v867_v34  ;;  %865 = vmax.xlane.f32.xlu0 %v864_v35 }
 0x417   :  { %1010 = vrot.lane.b32.xlu1 %v4630_v39, %s4524_s1 }
 0x41b   :  { %1086 = vrot.lane.b32.xlu1 %v4654_v43, %s4524_s1 }
 0x41c   :  { %934 = vrot.lane.b32.xlu0 %v4632_v41, %s4524_s1 }
 0x41d   :  { %v848_v36 = vpop.xlane.xlu0 %847 }
 0x41e   :  { %v870_v38 = vsub.f32 %v838_v60, %v848_v36 }
 0x41f   :  { %1162 = vrot.lane.b32.xlu1 %v4650_v42, %s4524_s1 }
 0x420   :  { %1238 = vrot.lane.b32.xlu0 %v4658_v44, %s4524_s1  ;;  %v878_v40 = vmul.f32 1.442695, %v870_v38 }
 0x422   :  { %4362 = vpow2.f32 %v878_v40 }
 0x423   :  { %1314 = vrot.lane.b32.xlu1 %v4664_v46, %s4524_s1 }
 0x424   :  { %v851_v47 = vpop.xlane.xlu1 %850 }
 0x425   :  { %v871_v39 = vsub.f32 %v839_v4, %v851_v47 }
 0x427   :  { %v880_v49 = vmul.f32 1.442695, %v871_v39 }
 0x429   :  { %4364 = vpow2.f32 %v880_v49 }
 0x42c   :  { %v4760_v43 = vpop.eup %4362 }
 0x42d   :  { %v894_v41 = vsel %vm211_vm2, %v4760_v43, 0.0 }
 0x433   :  { %v4764_v42 = vpop.eup %4364 }
 0x434   :  { %v897_v44 = vsel %vm211_vm2, %v4764_v42, 0.0 }
 0x43f   :  { %895 = vadd.xlane.f32.xlu0 %v894_v41 }
 0x447   :  { %898 = vadd.xlane.f32.xlu1 %v897_v44 }
 0x487   :  { %v857_v46 = vpop.xlane.xlu0 %856 }
 0x488   :  { %v873_v50 = vsub.f32 %v841_v12, %v857_v46 }
 0x48a   :  { %v884_v51 = vmul.f32 1.442695, %v873_v50 }
 0x48b   :  { %v854_v52 = vpop.xlane.xlu0 %853 }
 0x48c   :  { %4366 = vpow2.f32 %v884_v51  ;;  %v872_v53 = vsub.f32 %v840_v15, %v854_v52 }
 0x48e   :  { %v882_v54 = vmul.f32 1.442695, %v872_v53 }
 0x48f   :  { %v863_v55 = vpop.xlane.xlu1 %862  ;;  %v860_v56 = vpop.xlane.xlu0 %859 }
 0x490   :  { %4368 = vpow2.f32 %v882_v54  ;;  %v875_v58 = vsub.f32 %v843_v26, %v863_v55  ;;  %v874_v59 = vsub.f32 %v842_v23, %v860_v56  ;;  %v1574_v56 = vld [vmem:[%s5208_s3] sm:$0xff] }
 0x492   :  { %v888_v60 = vmul.f32 1.442695, %v875_v58  ;;  %v886_v61 = vmul.f32 1.442695, %v874_v59  ;;  %v1575_v58 = vld [vmem:[%s5208_s3 + $0x8] sm:$0xff] }
 0x493   :  { %v869_v62 = vpop.xlane.xlu1 %868  ;;  %v866_v2 = vpop.xlane.xlu0 %865  ;;  %v4272_v59 = vpack.c.bf16 %v1575_v58, %v1574_v56  ;;  %v1800_v56 = vld [vmem:[%s5210_s5 + $0x20] sm:$0xff]  ;;  %v1801_v58 = vld [vmem:[%s5210_s5 + $0x28] sm:$0xff] }
 0x494   :  { %4370 = vpow2.f32 %v888_v60  ;;  %v877_v3 = vsub.f32 %v845_v33, %v869_v62  ;;  %v876_v4 = vsub.f32 %v844_v32, %v866_v2  ;;  %v1576_v60 = vld [vmem:[%s5208_s3 + $0x10] sm:$0xff] }
 0x495   :  { %4372 = vpow2.f32 %v886_v61  ;;  %v1577_v61 = vld [vmem:[%s5208_s3 + $0x18] sm:$0xff] }
 0x496   :  { %v4367_v5 = vpop.eup %4366  ;;  %v892_v6 = vmul.f32 1.442695, %v877_v3  ;;  %v890_v7 = vmul.f32 1.442695, %v876_v4  ;;  %v4276_v62 = vpack.c.bf16 %v1577_v61, %v1576_v60 }
 0x497   :  { %v1011_v8 = vpop.permute.xlu1 %1010  ;;  %v935_v9 = vpop.permute.xlu0 %934  ;;  %v903_v10 = vsel %vm211_vm2, %v4367_v5, 0.0 }
 0x498   :  { %4374 = vpow2.f32 %v892_v6  ;;  %4057 = vmatpush3.msra.mxu1 %v1011_v8  ;;  %904 = vadd.xlane.f32.xlu1 %v903_v10 }
 0x499   :  { %4376 = vpow2.f32 %v890_v7  ;;  %4052 = vmatpush3.msra.mxu0 %v935_v9  ;;  %4066 = vmatprep.subr.mxu1 %v4518_v37 }
 0x49a   :  { %v4369_v11 = vpop.eup %4368  ;;  %4061 = vmatprep.subr.mxu0 %v4518_v37 }
 0x49b   :  { %v900_v12 = vsel %vm211_vm2, %v4369_v11, 0.0  ;;  %v1087_v21 = vpop.permute.xlu1 %1086  ;;  %v1239_v22 = vpop.permute.xlu0 %1238 }
 0x49c   :  { %901 = vadd.xlane.f32.xlu0 %v900_v12 }
 0x49e   :  { %v4371_v13 = vpop.eup %4370 }
 0x49f   :  { %v4373_v14 = vpop.eup %4372  ;;  %v909_v15 = vsel %vm211_vm2, %v4371_v13, 0.0  ;;  %v1163_v23 = vpop.permute.xlu1 %1162 }
 0x4a0   :  { %910 = vadd.xlane.f32.xlu1 %v909_v15  ;;  %v906_v16 = vsel %vm211_vm2, %v4373_v14, 0.0 }
 0x4a1   :  { %907 = vadd.xlane.f32.xlu0 %v906_v16 }
 0x4a2   :  { %v4774_v17 = vpop.eup %4374 }
 0x4a3   :  { %v4776_v18 = vpop.eup %4376  ;;  %v915_v19 = vsel %vm211_vm2, %v4774_v17, 0.0  ;;  %v1315_v25 = vpop.permute.xlu1 %1314 }
 0x4a4   :  { %916 = vadd.xlane.f32.xlu1 %v915_v19  ;;  %v912_v20 = vsel %vm211_vm2, %v4776_v18, 0.0 }
 0x4a5   :  { %913 = vadd.xlane.f32.xlu0 %v912_v20 }
 0x4b5   :  { %1466 = vrot.lane.b32.xlu1 %v4672_v48, %s4524_s1 }
 0x4bb   :  { %1390 = vrot.lane.b32.xlu0 %v4660_v45, %s4524_s1 }
 0x4cc   :  { %v896_v24 = vpop.xlane.xlu0 %895 }
 0x4cd   :  { %4378 = vrcp.f32 %v896_v24 }
 0x4d4   :  { %v899_v26 = vpop.xlane.xlu1 %898 }
 0x4d5   :  { %4380 = vrcp.f32 %v899_v26  ;;  %v3809_v26 = vld [vmem:[#allocation5 + $0x1] ss:$0 sm:$0xff] }
 0x4d7   :  { %v4379_v27 = vpop.eup %4378 }
 0x4d8   :  { %v926_v28 = vmul.f32 %v4379_v27, %v4760_v43 }
 0x4da   :  { %4054 = vmatmul.mubr.msk.f32.vlgmr.msra.gmra.mrb[6].mxu0 %vm211_vm2, %v926_v28 }
 0x4db   :  { %4062 = vmatpush3.msra.mxu0 %v1087_v21  ;;  %4063 = vmatprep.mubr.msk.f32.mxu0 %vm4519_vm1, %v4518_v37 }
 0x4dc   :  { %4071 = vmatprep.subr.mxu0 %v4518_v37 }
 0x4df   :  { %v4381_v45 = vpop.eup %4380 }
 0x4e0   :  { %v927_v48 = vmul.f32 %v4381_v45, %v4764_v42 }
 0x4e2   :  { %4059 = vmatmul.mubr.msk.f32.vlgmr.msra.gmra.mrb[12].mxu1 %vm211_vm2, %v927_v48 }
 0x4e3   :  { %4067 = vmatpush3.msra.mxu1 %v1163_v23  ;;  %4068 = vmatprep.mubr.msk.f32.mxu1 %vm4519_vm1, %v4518_v37 }
 0x4e4   :  { %4076 = vmatprep.subr.mxu1 %v4518_v37 }
 0x525   :  { %v905_v29 = vpop.xlane.xlu1 %904 }
 0x526   :  { %4382 = vrcp.f32 %v905_v29 }
 0x529   :  { %v902_v30 = vpop.xlane.xlu0 %901 }
 0x52a   :  { %4384 = vrcp.f32 %v902_v30 }
 0x52d   :  { %v911_v31 = vpop.xlane.xlu1 %910 }
 0x52e   :  { %4386 = vrcp.f32 %v911_v31  ;;  %v908_v32 = vpop.xlane.xlu0 %907 }
 0x52f   :  { %4388 = vrcp.f32 %v908_v32 }
 0x530   :  { %v4383_v33 = vpop.eup %4382 }
 0x531   :  { %v929_v34 = vmul.f32 %v4383_v33, %v4367_v5  ;;  %v917_v35 = vpop.xlane.xlu1 %916 }
 0x532   :  { %4390 = vrcp.f32 %v917_v35  ;;  %v914_v36 = vpop.xlane.xlu0 %913 }
 0x533   :  { %4392 = vrcp.f32 %v914_v36  ;;  %4069 = vmatmul.mubr.msk.f32.vlgmr.msra.gmra.mrb[14].mxu1 %vm211_vm2, %v929_v34 }
 0x534   :  { %v4385_v38 = vpop.eup %4384  ;;  %4077 = vmatpush3.msra.mxu1 %v1315_v25  ;;  %4078 = vmatprep.mubr.msk.f32.mxu1 %vm4519_vm1, %v4518_v37 }
 0x535   :  { %v928_v40 = vmul.f32 %v4385_v38, %v4369_v11  ;;  %4086 = vmatprep.subr.mxu1 %v4518_v37  ;;  %v1467_v41 = vpop.permute.xlu1 %1466 }
 0x536   :  { %v1391_v44 = vpop.permute.xlu0 %1390 }
 0x537   :  { %4064 = vmatmul.mubr.msk.f32.vlgmr.msra.gmra.mrb[8].mxu0 %vm211_vm2, %v928_v40 }
 0x538   :  { %v4387_v47 = vpop.eup %4386  ;;  %4072 = vmatpush3.msra.mxu0 %v1239_v22  ;;  %4073 = vmatprep.mubr.msk.f32.mxu0 %vm4519_vm1, %v4518_v37 }
 0x539   :  { %v4389_v39 = vpop.eup %4388  ;;  %v931_v49 = vmul.f32 %v4387_v47, %v4371_v13  ;;  %4081 = vmatprep.subr.mxu0 %v4518_v37 }
 0x53a   :  { %v930_v43 = vmul.f32 %v4389_v39, %v4373_v14 }
 0x53b   :  { %4079 = vmatmul.mubr.msk.f32.vlgmr.msra.gmra.mrb[16].mxu1 %vm211_vm2, %v931_v49  ;;  %v1705_v49 = vld [vmem:[%s5209_s4] sm:$0xff] }
 0x53c   :  { %v4391_v42 = vpop.eup %4390  ;;  %4074 = vmatmul.mubr.msk.f32.vlgmr.msra.gmra.mrb[10].mxu0 %vm211_vm2, %v930_v43  ;;  %4087 = vmatpush3.msra.mxu1 %v1467_v41  ;;  %v1706_v43 = vld [vmem:[%s5209_s4 + $0x8] sm:$0xff]  ;;  %v1707_v41 = vld [vmem:[%s5209_s4 + $0x10] sm:$0xff] }
 0x53d   :  { %v4393_v46 = vpop.eup %4392  ;;  %v933_v50 = vmul.f32 %v4391_v42, %v4774_v17  ;;  %4082 = vmatpush3.msra.mxu0 %v1391_v44  ;;  %4083 = vmatprep.mubr.msk.f32.mxu0 %vm4519_vm1, %v4518_v37  ;;  %v4280_v42 = vpack.c.bf16 %v1706_v43, %v1705_v49  ;;  %v1708_v44 = vld [vmem:[%s5209_s4 + $0x18] sm:$0xff]  ;;  %v3821_v49 = vld [vmem:[%s5207_s2 + $0x28] sm:$0xff]  ;;  %v3822_v43 = vld [vmem:[%s5207_s2 + $0x30] sm:$0xff] }
 0x53e   :  { %v932_v51 = vmul.f32 %v4393_v46, %v4776_v18  ;;  %4088 = vmatprep.mubr.msk.f32.mxu1 %vm4519_vm1, %v4518_v37  ;;  %4273 = vmatprep.subr.bf16.mxu0 %v4272_v59  ;;  %v4284_v46 = vpack.c.bf16 %v1708_v44, %v1707_v41 }
 0x53f   :  { %4089 = vmatmul.mubr.msk.f32.vlgmr.msra.gmra.mrb[18].mxu1 %vm211_vm2, %v933_v50  ;;  %4281 = vmatprep.subr.bf16.mxu1 %v4280_v42  ;;  %v1796_v50 = vld [vmem:[%s5210_s5] sm:$0xff] }
 0x540   :  { %4084 = vmatmul.mubr.msk.f32.vlgmr.msra.gmra.mrb[12].mxu0 %vm211_vm2, %v932_v51  ;;  %4283 = vmatpush3.bf16.msra.mxu1 %v4280_v42  ;;  %v1797_v51 = vld [vmem:[%s5210_s5 + $0x8] sm:$0xff]  ;;  %v3823_v42 = vld [vmem:[%s5207_s2 + $0x38] sm:$0xff] }
 0x541   :  { %4275 = vmatpush3.bf16.msra.mxu0 %v4272_v59  ;;  %4285 = vmatprep.subr.bf16.mxu1 %v4284_v46  ;;  %v4296_v59 = vpack.c.bf16 %v1801_v58, %v1800_v56  ;;  %v4308_v44 = vpack.c.bf16 %v3823_v42, %v3822_v43 }
 0x542   :  { %4277 = vmatprep.subr.bf16.mxu0 %v4276_v62 }
 0x544   :  { %4287 = vmatpush3.bf16.msra.mxu1 %v4284_v46 }
 0x545   :  { %4279 = vmatpush3.bf16.msra.mxu0 %v4276_v62 }
 0x5ad   :  { %v1006_v52 = vpop.f32.mrb[6].mxu0 }
 0x5ae   :  { %v4055_v53 = vpop.f32.mrb[7].mxu0 }
 0x5af   :  { %v4288_v53 = vpack.c.bf16 %v1797_v51, %v1796_v50 }
 0x5b1   :  { %4289 = vmatprep.subr.bf16.mxu0 %v4288_v53 }
 0x5b5   :  { %v1082_v54 = vpop.f32.mrb[12].mxu1 }
 0x5b6   :  { %v4060_v55 = vpop.f32.mrb[13].mxu1 }
 0x606   :  { %v1234_v2 = vpop.f32.mrb[14].mxu1 }
 0x607   :  { %1546 = vrot.lane.b32.xlu1 %v1234_v2, %s4516_s12  ;;  %v4070_v3 = vpop.f32.mrb[15].mxu1 }
 0x60a   :  { %v1158_v4 = vpop.f32.mrb[8].mxu0 }
 0x60b   :  { %1544 = vrot.lane.b32.xlu0 %v1158_v4, %s4516_s12  ;;  %v4065_v5 = vpop.f32.mrb[9].mxu0 }
 0x60c   :  { %v3810_v5 = vld [vmem:[#allocation5 + $0x6] ss:$0 sm:$0xff] }
 0x60e   :  { %v1386_v6 = vpop.f32.mrb[16].mxu1 }
 0x60f   :  { %v1310_v7 = vpop.f32.mrb[10].mxu0  ;;  %1554 = vrot.lane.b32.xlu1 %v1386_v6, %s4525_s26  ;;  %v4080_v8 = vpop.f32.mrb[17].mxu1 }
 0x610   :  { %1552 = vrot.lane.b32.xlu0 %v1310_v7, %s4525_s26  ;;  %v4075_v9 = vpop.f32.mrb[11].mxu0  ;;  %v3811_v8 = vld [vmem:[#allocation5 + $0x7] ss:$0 sm:$0xff] }
 0x612   :  { %v1538_v10 = vpop.f32.mrb[18].mxu1 }
 0x613   :  { %v1462_v11 = vpop.f32.mrb[12].mxu0  ;;  %1562 = vrot.lane.b32.xlu1 %v1538_v10, %s4526_s27  ;;  %v4090_v12 = vpop.f32.mrb[19].mxu1 }
 0x614   :  { %1560 = vrot.lane.b32.xlu0 %v1462_v11, %s4526_s27  ;;  %v4085_v13 = vpop.f32.mrb[13].mxu0 }
 0x679   :  { %v1547_v14 = vpop.permute.xlu1 %1546 }
 0x67a   :  { %v1567_v18 = vsel %vm211_vm2, %v1082_v54, %v1547_v14  ;;  %v1799_v54 = vld [vmem:[%s5210_s5 + $0x18] sm:$0xff] }
 0x67d   :  { %v1545_v15 = vpop.permute.xlu0 %1544 }
 0x67e   :  { %v1566_v19 = vsel %vm211_vm2, %v1006_v52, %v1545_v15  ;;  %v1798_v52 = vld [vmem:[%s5210_s5 + $0x10] sm:$0xff] }
 0x67f   :  { %v4292_v55 = vpack.c.bf16 %v1799_v54, %v1798_v52  ;;  %v1802_v15 = vld [vmem:[%s5210_s5 + $0x30] sm:$0xff] }
 0x681   :  { %v1555_v16 = vpop.permute.xlu1 %1554 }
 0x682   :  { %v1553_v17 = vpop.permute.xlu0 %1552  ;;  %v1570_v20 = vsel %vm1568_vm3, %v1567_v18, %v1555_v16  ;;  %v1803_v16 = vld [vmem:[%s5210_s5 + $0x38] sm:$0xff]  ;;  %v3812_v18 = vld [vmem:[#allocation5 + $0x2] ss:$0 sm:$0xff] }
 0x683   :  { %v1569_v22 = vsel %vm1568_vm3, %v1566_v19, %v1553_v17  ;;  %v4300_v17 = vpack.c.bf16 %v1803_v16, %v1802_v15 }
 0x685   :  { %v1563_v21 = vpop.permute.xlu1 %1562 }
 0x686   :  { %v1573_v23 = vsel %vm1571_vm4, %v1570_v20, %v1563_v21  ;;  %v1561_v24 = vpop.permute.xlu0 %1560 }
 0x687   :  { %v1572_v25 = vsel %vm1571_vm4, %v1569_v22, %v1561_v24 }
 0x688   :  { %4099 = vmatprep.mubr.msk.f32.mxu0 %vm67_vm0, %v1572_v25  ;;  %v3817_v25 = vld [vmem:[#allocation5 + $0x3] ss:$0 sm:$0xff] }
 0x689   :  { %4100 = vmatmul.mubr.msk.f32.vlgmr.msra.gmra.mrb[14].mxu0 %vm67_vm0, %v1573_v23 }
 0x68a   :  { %4291 = vmatpush3.bf16.msra.mxu0 %v4288_v53 }
 0x68b   :  { %4293 = vmatprep.subr.bf16.mxu0 %v4292_v55 }
 0x68e   :  { %4295 = vmatpush3.bf16.msra.mxu0 %v4292_v55  ;;  %v3818_v55 = vld [vmem:[#allocation5 + $0xc] ss:$0 sm:$0xff] }
 0x68f   :  { %4297 = vmatprep.subr.bf16.mxu0 %v4296_v59 }
 0x692   :  { %4299 = vmatpush3.bf16.msra.mxu0 %v4296_v59 }
 0x693   :  { %4301 = vmatprep.subr.bf16.mxu0 %v4300_v17 }
 0x696   :  { %4303 = vmatpush3.bf16.msra.mxu0 %v4300_v17 }
 0x697   :  { %4153 = vmatprep.subr.mxu0 %v4518_v37 }
 0x75c   :  { %v4101_v27 = vpop.f32.mrb[14].mxu0 }
 0x75d   :  { %v1660_v28 = vadd.f32 %v4101_v27, %v4600_v1  ;;  %v1650_v45 = vpop.f32.mrb[15].mxu0 }
 0x75e   :  { %v1659_v48 = vadd.f32 %v1650_v45, %v4598_v0 }
 0x75f   :  { %v4842_v29 = vadd.f32 %v3809_v26, %v1660_v28 }
 0x760   :  { %v4844_v30 = vadd.f32 %v3809_v26, %v1659_v48 }
 0x761   :  { %v1670_v31 = vsel %vm67_vm0, %v4842_v29, 0.0 }
 0x762   :  { %1671 = vadd.xlane.f32.xlu1 %v1670_v31  ;;  %v1667_v32 = vsel %vm67_vm0, %v4844_v30, 0.0 }
 0x763   :  { %1668 = vadd.xlane.f32.xlu0 %v1667_v32 }
 0x7ef   :  { %v1672_v33 = vpop.xlane.xlu1 %1671 }
 0x7f0   :  { %v1674_v34 = vmul.f32 0.03125, %v1672_v33  ;;  %v1669_v35 = vpop.xlane.xlu0 %1668 }
 0x7f1   :  { %v1673_v36 = vmul.f32 0.03125, %v1669_v35 }
 0x7f2   :  { %v1676_v1 = vsub.f32 %v4842_v29, %v1674_v34 }
 0x7f3   :  { %v1675_v0 = vsub.f32 %v4844_v30, %v1673_v36 }
 0x7f4   :  { %v1678_v47 = vmul.f32 %v1676_v1, %v1676_v1  ;;  %v1692_v10 = vmul.f32 %v3810_v5, %v1676_v1 }
 0x7f5   :  { %v1677_v38 = vmul.f32 %v1675_v0, %v1675_v0  ;;  %v1691_v6 = vmul.f32 %v3810_v5, %v1675_v0  ;;  %v3824_v5 = vld [vmem:[#allocation5 + $0x8] ss:$0 sm:$0xff] }
 0x7f6   :  { %v1682_v39 = vsel %vm67_vm0, %v1678_v47, 0.0 }
 0x7f7   :  { %v1679_v40 = vsel %vm67_vm0, %v1677_v38, 0.0 }
 0x7f8   :  { %1680 = vadd.xlane.f32.xlu0 %v1679_v40 }
 0x7fc   :  { %1683 = vadd.xlane.f32.xlu0 %v1682_v39  ;;  %v3820_v39 = vld [vmem:[%s5207_s2 + $0x20] sm:$0xff] }
 0x7fd   :  { %v4304_v41 = vpack.c.bf16 %v3821_v49, %v3820_v39 }
 0x7ff   :  { %4305 = vmatprep.subr.bf16.mxu1 %v4304_v41 }
 0x885   :  { %v1681_v60 = vpop.xlane.xlu0 %1680 }
 0x886   :  { %v1685_v61 = vmul.f32 0.032258064, %v1681_v60 }
 0x888   :  { %v1693_v62 = vadd.f32 1e-32, %v1685_v61  ;;  %v3819_v61 = vld [vmem:[#allocation5 + $0xd] ss:$0 sm:$0xff] }
 0x889   :  { %v1684_v2 = vpop.xlane.xlu0 %1683 }
 0x88a   :  { %4394 = vrsqrt.f32 %v1693_v62  ;;  %v1686_v3 = vmul.f32 0.032258064, %v1684_v2 }
 0x88c   :  { %v1694_v4 = vadd.f32 1e-32, %v1686_v3 }
 0x88e   :  { %4396 = vrsqrt.f32 %v1694_v4 }
 0x894   :  { %v4395_v7 = vpop.eup %4394 }
 0x895   :  { %v1697_v9 = vmul.f32 %v4395_v7, %v1691_v6 }
 0x897   :  { %v1703_v11 = vadd.f32 %v3811_v8, %v1697_v9 }
 0x898   :  { %v4397_v12 = vpop.eup %4396 }
 0x899   :  { %v1698_v13 = vmul.f32 %v4397_v12, %v1692_v10  ;;  %4110 = vmatprep.mubr.msk.f32.mxu1 %vm67_vm0, %v1703_v11 }
 0x89b   :  { %v1704_v14 = vadd.f32 %v3811_v8, %v1698_v13 }
 0x89d   :  { %4111 = vmatmul.mubr.msk.f32.vlgmr.msra.gmra.mrb[20].mxu1 %vm67_vm0, %v1704_v14 }
 0x89e   :  { %4307 = vmatpush3.bf16.msra.mxu1 %v4304_v41 }
 0x89f   :  { %4309 = vmatprep.subr.bf16.mxu1 %v4308_v44 }
 0x8a2   :  { %4311 = vmatpush3.bf16.msra.mxu1 %v4308_v44 }
 0x8a3   :  { %4143 = vmatprep.subr.mxu1 %v4518_v37 }
 0x970   :  { %v4112_v19 = vpop.f32.mrb[20].mxu1 }
 0x971   :  { %v1791_v20 = vadd.f32 %v4112_v19, %v3812_v18  ;;  %v1785_v21 = vpop.f32.mrb[21].mxu1 }
 0x972   :  { %v1786_v22 = vadd.f32 %v3812_v18, %v1785_v21 }
 0x973   :  { %v1795_v24 = vmax.f32 %v1791_v20, 0.0 }
 0x974   :  { %v1794_v23 = vmax.f32 %v1786_v22, 0.0 }
 0x976   :  { %4129 = vmatprep.mubr.msk.f32.mxu0 %vm1804_vm5, %v1794_v23 }
 0x977   :  { %4130 = vmatmul.mubr.msk.f32.vlgmr.msra.gmra.mrb[16].mxu0 %vm1804_vm5, %v1795_v24 }
 0x978   :  { %4155 = vmatprep.mubr.msk.f32.mxu0 %vm4519_vm1, %v4518_v37 }
 0xa4a   :  { %v4131_v26 = vpop.f32.mrb[16].mxu0 }
 0xa4b   :  { %v1887_v27 = vadd.f32 %v4131_v26, %v4842_v29  ;;  %v1877_v28 = vpop.f32.mrb[17].mxu0 }
 0xa4c   :  { %v1886_v45 = vadd.f32 %v1877_v28, %v4844_v30 }
 0xa4d   :  { %v4899_v48 = vadd.f32 %v3817_v25, %v1887_v27 }
 0xa4e   :  { %v4901_v31 = vadd.f32 %v3817_v25, %v1886_v45 }
 0xa4f   :  { %v1905_v32 = vsel %vm67_vm0, %v4899_v48, 0.0 }
 0xa50   :  { %1906 = vadd.xlane.f32.xlu1 %v1905_v32  ;;  %v1902_v33 = vsel %vm67_vm0, %v4901_v31, 0.0 }
 0xa51   :  { %1903 = vadd.xlane.f32.xlu0 %v1902_v33 }
 0xadd   :  { %v1907_v34 = vpop.xlane.xlu1 %1906 }
 0xade   :  { %v1909_v35 = vmul.f32 0.03125, %v1907_v34  ;;  %v1904_v36 = vpop.xlane.xlu0 %1903 }
 0xadf   :  { %v1908_v1 = vmul.f32 0.03125, %v1904_v36 }
 0xae0   :  { %v1911_v29 = vsub.f32 %v4899_v48, %v1909_v35 }
 0xae1   :  { %v1910_v30 = vsub.f32 %v4901_v31, %v1908_v1 }
 0xae2   :  { %v1913_v0 = vmul.f32 %v1911_v29, %v1911_v29  ;;  %v1927_v56 = vmul.f32 %v3818_v55, %v1911_v29 }
 0xae3   :  { %v1912_v38 = vmul.f32 %v1910_v30, %v1910_v30  ;;  %v1926_v59 = vmul.f32 %v3818_v55, %v1910_v30 }
 0xae4   :  { %v1917_v40 = vsel %vm67_vm0, %v1913_v0, 0.0 }
 0xae5   :  { %1918 = vadd.xlane.f32.xlu1 %v1917_v40  ;;  %v1914_v47 = vsel %vm67_vm0, %v1912_v38, 0.0 }
 0xae6   :  { %1915 = vadd.xlane.f32.xlu0 %v1914_v47 }
 0xb72   :  { %v1919_v46 = vpop.xlane.xlu1 %1918 }
 0xb73   :  { %v1921_v50 = vmul.f32 0.032258064, %v1919_v46  ;;  %v1916_v51 = vpop.xlane.xlu0 %1915 }
 0xb74   :  { %v1920_v52 = vmul.f32 0.032258064, %v1916_v51 }
 0xb75   :  { %v1929_v53 = vadd.f32 1e-32, %v1921_v50 }
 0xb76   :  { %v1928_v54 = vadd.f32 1e-32, %v1920_v52 }
 0xb77   :  { %4398 = vrsqrt.f32 %v1929_v53 }
 0xb78   :  { %4400 = vrsqrt.f32 %v1928_v54 }
 0xb81   :  { %v4399_v58 = vpop.eup %4398 }
 0xb82   :  { %v4401_v60 = vpop.eup %4400  ;;  %v1933_v62 = vmul.f32 %v4399_v58, %v1927_v56 }
 0xb83   :  { %v1932_v2 = vmul.f32 %v4401_v60, %v1926_v59 }
 0xb84   :  { %v1939_v4 = vadd.f32 %v3819_v61, %v1933_v62 }
 0xb85   :  { %v1938_v3 = vadd.f32 %v3819_v61, %v1932_v2 }
 0xb87   :  { %4140 = vmatprep.mubr.msk.f32.mxu1 %vm67_vm0, %v1938_v3 }
 0xb88   :  { %4141 = vmatmul.mubr.msk.f32.vlgmr.msra.gmra.mrb[22].mxu1 %vm67_vm0, %v1939_v4 }
 0xb89   :  { %4145 = vmatprep.mubr.msk.f32.mxu1 %vm4519_vm1, %v4518_v37 }
 0xc5b   :  { %v4142_v6 = vpop.f32.mrb[22].mxu1 }
 0xc5c   :  { %v4928_v7 = vadd.f32 %v4142_v6, %v3824_v5  ;;  %v2021_v8 = vpop.f32.mrb[23].mxu1 }
 0xc5d   :  { %v4930_v9 = vadd.f32 %v3824_v5, %v2021_v8 }
 0xc5e   :  { %2034 = vrot.lane.b32.xlu1 %v4928_v7, %s4520_s10 }
 0xc5f   :  { %2032 = vrot.lane.b32.xlu0 %v4930_v9, %s4520_s10 }
 0xc62   :  { %2036 = vrot.lane.b32.xlu1 %v4930_v9, %s4521_s13 }
 0xc63   :  { %2040 = vrot.lane.b32.xlu0 %v4930_v9, %s4522_s14 }
 0xc66   :  { %2038 = vrot.lane.b32.xlu1 %v4928_v7, %s4521_s13 }
 0xc67   :  { %2044 = vrot.lane.b32.xlu0 %v4930_v9, %s4523_s15 }
 0xc6a   :  { %2042 = vrot.lane.b32.xlu1 %v4928_v7, %s4522_s14 }
 0xc6e   :  { %2120 = vrot.lane.b32.xlu1 %v4928_v7, %s4523_s15 }
 0xcd0   :  { %v4948_v10 = vpop.permute.xlu1 %2034 }
 0xcd1   :  { %2272 = vrot.lane.b32.xlu1 %v4948_v10, %s4523_s15  ;;  %v4952_v11 = vpop.permute.xlu0 %2032 }
 0xcd2   :  { %2196 = vrot.lane.b32.xlu0 %v4952_v11, %s4523_s15 }
 0xcd4   :  { %v4956_v12 = vpop.permute.xlu1 %2036 }
 0xcd5   :  { %v4958_v13 = vpop.permute.xlu0 %2040 }
 0xcd6   :  { %2348 = vrot.lane.b32.xlu0 %v4956_v12, %s4523_s15 }
 0xcd8   :  { %v4962_v14 = vpop.permute.xlu1 %2038 }
 0xcd9   :  { %2424 = vrot.lane.b32.xlu1 %v4962_v14, %s4523_s15  ;;  %v2045_v15 = vpop.permute.xlu0 %2044 }
 0xcda   :  { %2500 = vrot.lane.b32.xlu0 %v4958_v13, %s4523_s15  ;;  %4144 = vmatpush3.xpose.msk.msra.mxu1 %vm211_vm2, %v2045_v15 }
 0xcdb   :  { %4148 = vmatprep.subr.mxu1 %v4518_v37 }
 0xcdc   :  { %v4970_v16 = vpop.permute.xlu1 %2042 }
 0xcdd   :  { %2576 = vrot.lane.b32.xlu1 %v4970_v16, %s4523_s15  ;;  %4146 = vmatmul.mubr.msk.f32.vlgmr.msra.gmra.mrb[24].mxu1 %vm211_vm2, %v4930_v9 }
 0xcde   :  { %4150 = vmatprep.mubr.msk.f32.mxu1 %vm4519_vm1, %v4518_v37 }
 0xce0   :  { %v2121_v17 = vpop.permute.xlu1 %2120 }
 0xce1   :  { %4149 = vmatpush3.xpose.msk.msra.mxu1 %vm211_vm2, %v2121_v17 }
 0xce2   :  { %4158 = vmatprep.subr.mxu1 %v4518_v37 }
 0xce4   :  { %4151 = vmatmul.mubr.msk.f32.vlgmr.msra.gmra.mrb[26].mxu1 %vm211_vm2, %v4928_v7 }
 0xce5   :  { %4160 = vmatprep.mubr.msk.f32.mxu1 %vm4519_vm1, %v4518_v37 }
 0xd43   :  { %v2273_v18 = vpop.permute.xlu1 %2272 }
 0xd44   :  { %4159 = vmatpush3.xpose.msk.msra.mxu1 %vm211_vm2, %v2273_v18  ;;  %v2197_v19 = vpop.permute.xlu0 %2196 }
 0xd45   :  { %4154 = vmatpush3.xpose.msk.msra.mxu0 %vm211_vm2, %v2197_v19  ;;  %4168 = vmatprep.subr.mxu1 %v4518_v37 }
 0xd46   :  { %4163 = vmatprep.subr.mxu0 %v4518_v37 }
 0xd47   :  { %4161 = vmatmul.mubr.msk.f32.vlgmr.msra.gmra.mrb[28].mxu1 %vm211_vm2, %v4948_v10 }
 0xd48   :  { %4156 = vmatmul.mubr.msk.f32.vlgmr.msra.gmra.mrb[18].mxu0 %vm211_vm2, %v4952_v11  ;;  %v2349_v20 = vpop.permute.xlu0 %2348  ;;  %4170 = vmatprep.mubr.msk.f32.mxu1 %vm4519_vm1, %v4518_v37 }
 0xd49   :  { %4164 = vmatpush3.xpose.msk.msra.mxu0 %vm211_vm2, %v2349_v20  ;;  %4165 = vmatprep.mubr.msk.f32.mxu0 %vm4519_vm1, %v4518_v37 }
 0xd4a   :  { %4173 = vmatprep.subr.mxu0 %v4518_v37 }
 0xd4b   :  { %v2425_v21 = vpop.permute.xlu1 %2424 }
 0xd4c   :  { %4166 = vmatmul.mubr.msk.f32.vlgmr.msra.gmra.mrb[20].mxu0 %vm211_vm2, %v4956_v12  ;;  %4169 = vmatpush3.xpose.msk.msra.mxu1 %vm211_vm2, %v2425_v21  ;;  %v2501_v22 = vpop.permute.xlu0 %2500 }
 0xd4d   :  { %4174 = vmatpush3.xpose.msk.msra.mxu0 %vm211_vm2, %v2501_v22  ;;  %4175 = vmatprep.mubr.msk.f32.mxu0 %vm4519_vm1, %v4518_v37 }
 0xd4e   :  { %4178 = vmatprep.subr.mxu1 %v4518_v37  ;;  %4183 = vmatprep.subr.mxu0 %v4518_v37 }
 0xd4f   :  { %v2577_v23 = vpop.permute.xlu1 %2576  ;;  %4171 = vmatmul.mubr.msk.f32.vlgmr.msra.gmra.mrb[30].mxu1 %vm211_vm2, %v4962_v14 }
 0xd50   :  { %4176 = vmatmul.mubr.msk.f32.vlgmr.msra.gmra.mrb[22].mxu0 %vm211_vm2, %v4958_v13  ;;  %4179 = vmatpush3.xpose.msk.msra.mxu1 %vm211_vm2, %v2577_v23 }
 0xd51   :  { %4180 = vmatprep.mubr.msk.f32.mxu1 %vm4519_vm1, %v4518_v37  ;;  %4188 = vmatprep.subr.mxu1 %v4518_v37 }
 0xd52   :  { %4185 = vmatprep.mubr.msk.f32.mxu0 %vm4519_vm1, %v4518_v37 }
 0xd53   :  { %4181 = vmatmul.mubr.msk.f32.vlgmr.msra.gmra.mrb[32].mxu1 %vm211_vm2, %v4970_v16 }
 0xd54   :  { %4190 = vmatprep.mubr.msk.f32.mxu1 %vm4519_vm1, %v4518_v37 }
 0xdb0   :  { %v2116_v24 = vpop.f32.mrb[24].mxu1 }
 0xdb1   :  { %v2652_v25 = vmul.f32 0.35355338, %v2116_v24  ;;  %v4147_v26 = vpop.f32.mrb[25].mxu1 }
 0xdb3   :  { %v2660_v27 = vadd.f32 %v4725_v57, %v2652_v25 }
 0xdb5   :  { %v2668_v28 = vsel %vm211_vm2, %v2660_v27, -inf }
 0xdb6   :  { %2669 = vmax.xlane.f32.xlu0 %v2668_v28 }
 0xdb7   :  { %v2192_v45 = vpop.f32.mrb[26].mxu1 }
 0xdb8   :  { %v2653_v32 = vmul.f32 0.35355338, %v2192_v45  ;;  %v4152_v33 = vpop.f32.mrb[27].mxu1 }
 0xdba   :  { %v2661_v34 = vadd.f32 %v4732_v63, %v2653_v32 }
 0xdbc   :  { %v2671_v35 = vsel %vm211_vm2, %v2661_v34, -inf }
 0xdbd   :  { %2672 = vmax.xlane.f32.xlu1 %v2671_v35 }
 0xe1a   :  { %v2344_v36 = vpop.f32.mrb[28].mxu1 }
 0xe1b   :  { %v2655_v1 = vmul.f32 0.35355338, %v2344_v36  ;;  %v2268_v29 = vpop.f32.mrb[18].mxu0  ;;  %v4162_v30 = vpop.f32.mrb[29].mxu1 }
 0xe1c   :  { %v2654_v0 = vmul.f32 0.35355338, %v2268_v29  ;;  %v4157_v38 = vpop.f32.mrb[19].mxu0 }
 0xe1d   :  { %v2663_v40 = vadd.f32 %v4732_v63, %v2655_v1 }
 0xe1e   :  { %v2662_v49 = vadd.f32 %v4725_v57, %v2654_v0 }
 0xe1f   :  { %v2420_v47 = vpop.f32.mrb[20].mxu0  ;;  %v2677_v39 = vsel %vm211_vm2, %v2663_v40, -inf }
 0xe20   :  { %v2656_v43 = vmul.f32 0.35355338, %v2420_v47  ;;  %2678 = vmax.xlane.f32.xlu0 %v2677_v39  ;;  %v4167_v41 = vpop.f32.mrb[21].mxu0  ;;  %v2674_v51 = vsel %vm211_vm2, %v2662_v49, -inf }
 0xe22   :  { %v2496_v42 = vpop.f32.mrb[30].mxu1  ;;  %v2664_v52 = vadd.f32 %v4725_v57, %v2656_v43 }
 0xe23   :  { %v2657_v44 = vmul.f32 0.35355338, %v2496_v42  ;;  %v4172_v46 = vpop.f32.mrb[31].mxu1  ;;  %v2572_v50 = vpop.f32.mrb[22].mxu0 }
 0xe24   :  { %v2658_v53 = vmul.f32 0.35355338, %v2572_v50  ;;  %2675 = vmax.xlane.f32.xlu0 %v2674_v51  ;;  %v4177_v54 = vpop.f32.mrb[23].mxu0  ;;  %v2680_v61 = vsel %vm211_vm2, %v2664_v52, -inf }
 0xe25   :  { %v2665_v55 = vadd.f32 %v4732_v63, %v2657_v44 }
 0xe26   :  { %v2648_v56 = vpop.f32.mrb[32].mxu1  ;;  %v2666_v62 = vadd.f32 %v4725_v57, %v2658_v53 }
 0xe27   :  { %v2659_v58 = vmul.f32 0.35355338, %v2648_v56  ;;  %v4182_v59 = vpop.f32.mrb[33].mxu1  ;;  %v2683_v60 = vsel %vm211_vm2, %v2665_v55, -inf }
 0xe28   :  { %2684 = vmax.xlane.f32.xlu1 %v2683_v60  ;;  %2681 = vmax.xlane.f32.xlu0 %v2680_v61  ;;  %v2686_v4 = vsel %vm211_vm2, %v2666_v62, -inf }
 0xe29   :  { %v2667_v2 = vadd.f32 %v4732_v63, %v2659_v58 }
 0xe2b   :  { %v2689_v3 = vsel %vm211_vm2, %v2667_v2, -inf }
 0xe2c   :  { %2690 = vmax.xlane.f32.xlu1 %v2689_v3  ;;  %2687 = vmax.xlane.f32.xlu0 %v2686_v4 }
 0xe3d   :  { %2832 = vrot.lane.b32.xlu1 %v4928_v7, %s4524_s1 }
 0xe41   :  { %2908 = vrot.lane.b32.xlu1 %v4952_v11, %s4524_s1 }
 0xe42   :  { %2756 = vrot.lane.b32.xlu0 %v4930_v9, %s4524_s1 }
 0xe43   :  { %v2670_v57 = vpop.xlane.xlu0 %2669 }
 0xe44   :  { %v2692_v63 = vsub.f32 %v2660_v27, %v2670_v57 }
 0xe45   :  { %2984 = vrot.lane.b32.xlu1 %v4948_v10, %s4524_s1 }
 0xe46   :  { %3060 = vrot.lane.b32.xlu0 %v4956_v12, %s4524_s1  ;;  %v2700_v5 = vmul.f32 1.442695, %v2692_v63 }
 0xe48   :  { %4402 = vpow2.f32 %v2700_v5 }
 0xe49   :  { %3136 = vrot.lane.b32.xlu1 %v4962_v14, %s4524_s1 }
 0xe4a   :  { %v2673_v6 = vpop.xlane.xlu1 %2672 }
 0xe4b   :  { %v2693_v7 = vsub.f32 %v2661_v34, %v2673_v6 }
 0xe4d   :  { %v2702_v8 = vmul.f32 1.442695, %v2693_v7 }
 0xe4f   :  { %4404 = vpow2.f32 %v2702_v8 }
 0xe52   :  { %v5048_v11 = vpop.eup %4402 }
 0xe53   :  { %v2716_v9 = vsel %vm211_vm2, %v5048_v11, 0.0 }
 0xe59   :  { %v5052_v10 = vpop.eup %4404 }
 0xe5a   :  { %v2719_v12 = vsel %vm211_vm2, %v5052_v10, 0.0 }
 0xe65   :  { %2717 = vadd.xlane.f32.xlu0 %v2716_v9 }
 0xe6d   :  { %2720 = vadd.xlane.f32.xlu1 %v2719_v12 }
 0xead   :  { %v2679_v14 = vpop.xlane.xlu0 %2678 }
 0xeae   :  { %v2695_v15 = vsub.f32 %v2663_v40, %v2679_v14 }
 0xeb0   :  { %v2706_v17 = vmul.f32 1.442695, %v2695_v15 }
 0xeb1   :  { %v2676_v18 = vpop.xlane.xlu0 %2675 }
 0xeb2   :  { %4406 = vpow2.f32 %v2706_v17  ;;  %v2694_v19 = vsub.f32 %v2662_v49, %v2676_v18 }
 0xeb4   :  { %v2704_v20 = vmul.f32 1.442695, %v2694_v19 }
 0xeb5   :  { %v2685_v21 = vpop.xlane.xlu1 %2684  ;;  %v2682_v22 = vpop.xlane.xlu0 %2681 }
 0xeb6   :  { %4408 = vpow2.f32 %v2704_v20  ;;  %v2697_v23 = vsub.f32 %v2665_v55, %v2685_v21  ;;  %v2696_v24 = vsub.f32 %v2664_v52, %v2682_v22  ;;  %v3851_v20 = vld [vmem:[%s5208_s3 + $0x20] sm:$0xff]  ;;  %v3852_v21 = vld [vmem:[%s5208_s3 + $0x28] sm:$0xff] }
 0xeb7   :  { %v4312_v22 = vpack.c.bf16 %v3852_v21, %v3851_v20 }
 0xeb8   :  { %v2710_v25 = vmul.f32 1.442695, %v2697_v23  ;;  %v2708_v26 = vmul.f32 1.442695, %v2696_v24  ;;  %v3854_v23 = vld [vmem:[%s5208_s3 + $0x38] sm:$0xff] }
 0xeb9   :  { %v2691_v27 = vpop.xlane.xlu1 %2690  ;;  %v2688_v28 = vpop.xlane.xlu0 %2687 }
 0xeba   :  { %4410 = vpow2.f32 %v2710_v25  ;;  %v2699_v45 = vsub.f32 %v2667_v2, %v2691_v27  ;;  %v2698_v32 = vsub.f32 %v2666_v62, %v2688_v28 }
 0xebb   :  { %4412 = vpow2.f32 %v2708_v26 }
 0xebc   :  { %v4407_v33 = vpop.eup %4406  ;;  %v2714_v34 = vmul.f32 1.442695, %v2699_v45  ;;  %v2712_v35 = vmul.f32 1.442695, %v2698_v32 }
 0xebd   :  { %v2833_v36 = vpop.permute.xlu1 %2832  ;;  %v2757_v1 = vpop.permute.xlu0 %2756  ;;  %v2725_v29 = vsel %vm211_vm2, %v4407_v33, 0.0 }
 0xebe   :  { %4414 = vpow2.f32 %v2714_v34  ;;  %4189 = vmatpush3.msra.mxu1 %v2833_v36  ;;  %2726 = vadd.xlane.f32.xlu1 %v2725_v29 }
 0xebf   :  { %4416 = vpow2.f32 %v2712_v35  ;;  %4184 = vmatpush3.msra.mxu0 %v2757_v1  ;;  %4198 = vmatprep.subr.mxu1 %v4518_v37 }
 0xec0   :  { %v4409_v30 = vpop.eup %4408  ;;  %4193 = vmatprep.subr.mxu0 %v4518_v37 }
 0xec1   :  { %v2722_v0 = vsel %vm211_vm2, %v4409_v30, 0.0  ;;  %v2909_v44 = vpop.permute.xlu1 %2908  ;;  %v3061_v46 = vpop.permute.xlu0 %3060 }
 0xec2   :  { %2723 = vadd.xlane.f32.xlu0 %v2722_v0 }
 0xec4   :  { %v4411_v38 = vpop.eup %4410 }
 0xec5   :  { %v4413_v40 = vpop.eup %4412  ;;  %v2731_v47 = vsel %vm211_vm2, %v4411_v38, 0.0  ;;  %v2985_v50 = vpop.permute.xlu1 %2984 }
 0xec6   :  { %2732 = vadd.xlane.f32.xlu1 %v2731_v47  ;;  %v2728_v39 = vsel %vm211_vm2, %v4413_v40, 0.0 }
 0xec7   :  { %2729 = vadd.xlane.f32.xlu0 %v2728_v39 }
 0xec8   :  { %v5062_v49 = vpop.eup %4414 }
 0xec9   :  { %v5064_v43 = vpop.eup %4416  ;;  %v2737_v41 = vsel %vm211_vm2, %v5062_v49, 0.0  ;;  %v3137_v52 = vpop.permute.xlu1 %3136 }
 0xeca   :  { %2738 = vadd.xlane.f32.xlu1 %v2737_v41  ;;  %v2734_v42 = vsel %vm211_vm2, %v5064_v43, 0.0 }
 0xecb   :  { %2735 = vadd.xlane.f32.xlu0 %v2734_v42 }
 0xedb   :  { %3288 = vrot.lane.b32.xlu1 %v4970_v16, %s4524_s1 }
 0xee1   :  { %3212 = vrot.lane.b32.xlu0 %v4958_v13, %s4524_s1 }
 0xef2   :  { %v2718_v51 = vpop.xlane.xlu0 %2717 }
 0xef3   :  { %4418 = vrcp.f32 %v2718_v51 }
 0xefa   :  { %v2721_v53 = vpop.xlane.xlu1 %2720 }
 0xefb   :  { %4420 = vrcp.f32 %v2721_v53 }
 0xefd   :  { %v4419_v54 = vpop.eup %4418 }
 0xefe   :  { %v2748_v55 = vmul.f32 %v4419_v54, %v5048_v11 }
 0xf00   :  { %4186 = vmatmul.mubr.msk.f32.vlgmr.msra.gmra.mrb[24].mxu0 %vm211_vm2, %v2748_v55 }
 0xf01   :  { %4194 = vmatpush3.msra.mxu0 %v2909_v44  ;;  %4195 = vmatprep.mubr.msk.f32.mxu0 %vm4519_vm1, %v4518_v37 }
 0xf02   :  { %4203 = vmatprep.subr.mxu0 %v4518_v37 }
 0xf05   :  { %v4421_v13 = vpop.eup %4420 }
 0xf06   :  { %v2749_v16 = vmul.f32 %v4421_v13, %v5052_v10 }
 0xf08   :  { %4191 = vmatmul.mubr.msk.f32.vlgmr.msra.gmra.mrb[34].mxu1 %vm211_vm2, %v2749_v16 }
 0xf09   :  { %4199 = vmatpush3.msra.mxu1 %v2985_v50  ;;  %4200 = vmatprep.mubr.msk.f32.mxu1 %vm4519_vm1, %v4518_v37  ;;  %v3857_v50 = vld [vmem:[#allocation5 + $0x9] ss:$0 sm:$0xff] }
 0xf0a   :  { %4208 = vmatprep.subr.mxu1 %v4518_v37 }
 0xf4b   :  { %v2727_v56 = vpop.xlane.xlu1 %2726 }
 0xf4c   :  { %4422 = vrcp.f32 %v2727_v56 }
 0xf4f   :  { %v2724_v58 = vpop.xlane.xlu0 %2723 }
 0xf50   :  { %4424 = vrcp.f32 %v2724_v58 }
 0xf53   :  { %v2733_v59 = vpop.xlane.xlu1 %2732 }
 0xf54   :  { %4426 = vrcp.f32 %v2733_v59  ;;  %v2730_v60 = vpop.xlane.xlu0 %2729 }
 0xf55   :  { %4428 = vrcp.f32 %v2730_v60 }
 0xf56   :  { %v4423_v61 = vpop.eup %4422 }
 0xf57   :  { %v2751_v62 = vmul.f32 %v4423_v61, %v4407_v33  ;;  %v2739_v2 = vpop.xlane.xlu1 %2738 }
 0xf58   :  { %4430 = vrcp.f32 %v2739_v2  ;;  %v2736_v3 = vpop.xlane.xlu0 %2735 }
 0xf59   :  { %4432 = vrcp.f32 %v2736_v3  ;;  %4201 = vmatmul.mubr.msk.f32.vlgmr.msra.gmra.mrb[36].mxu1 %vm211_vm2, %v2751_v62 }
 0xf5a   :  { %v4425_v4 = vpop.eup %4424  ;;  %4209 = vmatpush3.msra.mxu1 %v3137_v52  ;;  %4210 = vmatprep.mubr.msk.f32.mxu1 %vm4519_vm1, %v4518_v37 }
 0xf5b   :  { %v2750_v57 = vmul.f32 %v4425_v4, %v4409_v30  ;;  %4218 = vmatprep.subr.mxu1 %v4518_v37  ;;  %v3289_v8 = vpop.permute.xlu1 %3288 }
 0xf5c   :  { %v3213_v9 = vpop.permute.xlu0 %3212 }
 0xf5d   :  { %4196 = vmatmul.mubr.msk.f32.vlgmr.msra.gmra.mrb[26].mxu0 %vm211_vm2, %v2750_v57  ;;  %v3860_v57 = vld [vmem:[%s5209_s4 + $0x20] sm:$0xff] }
 0xf5e   :  { %v4427_v63 = vpop.eup %4426  ;;  %4204 = vmatpush3.msra.mxu0 %v3061_v46  ;;  %4205 = vmatprep.mubr.msk.f32.mxu0 %vm4519_vm1, %v4518_v37 }
 0xf5f   :  { %v4429_v5 = vpop.eup %4428  ;;  %v2753_v6 = vmul.f32 %v4427_v63, %v4411_v38  ;;  %4213 = vmatprep.subr.mxu0 %v4518_v37  ;;  %v3861_v63 = vld [vmem:[%s5209_s4 + $0x28] sm:$0xff] }
 0xf60   :  { %v2752_v7 = vmul.f32 %v4429_v5, %v4413_v40  ;;  %v3862_v5 = vld [vmem:[%s5209_s4 + $0x30] sm:$0xff] }
 0xf61   :  { %4211 = vmatmul.mubr.msk.f32.vlgmr.msra.gmra.mrb[38].mxu1 %vm211_vm2, %v2753_v6  ;;  %v4320_v6 = vpack.c.bf16 %v3861_v63, %v3860_v57 }
 0xf62   :  { %v4431_v11 = vpop.eup %4430  ;;  %4206 = vmatmul.mubr.msk.f32.vlgmr.msra.gmra.mrb[28].mxu0 %vm211_vm2, %v2752_v7  ;;  %4219 = vmatpush3.msra.mxu1 %v3289_v8  ;;  %v3863_v7 = vld [vmem:[%s5209_s4 + $0x38] sm:$0xff] }
 0xf63   :  { %v4433_v10 = vpop.eup %4432  ;;  %v2755_v12 = vmul.f32 %v4431_v11, %v5062_v49  ;;  %4214 = vmatpush3.msra.mxu0 %v3213_v9  ;;  %4215 = vmatprep.mubr.msk.f32.mxu0 %vm4519_vm1, %v4518_v37  ;;  %v4324_v8 = vpack.c.bf16 %v3863_v7, %v3862_v5  ;;  %v3867_v11 = vld [vmem:[%s5210_s5 + $0x40] sm:$0xff]  ;;  %v3868_v9 = vld [vmem:[%s5210_s5 + $0x48] sm:$0xff] }
 0xf64   :  { %v2754_v14 = vmul.f32 %v4433_v10, %v5064_v43  ;;  %4220 = vmatprep.mubr.msk.f32.mxu1 %vm4519_vm1, %v4518_v37  ;;  %4313 = vmatprep.subr.bf16.mxu0 %v4312_v22  ;;  %v3853_v37 = vld [vmem:[%s5208_s3 + $0x30] sm:$0xff]  ;;  %v3878_v5 = vld [vmem:[#allocation5 + $0x10] ss:$0 sm:$0xff] }
 0xf65   :  { %4221 = vmatmul.mubr.msk.f32.vlgmr.msra.gmra.mrb[40].mxu1 %vm211_vm2, %v2755_v12  ;;  %v4316_v24 = vpack.c.bf16 %v3854_v23, %v3853_v37  ;;  %4321 = vmatprep.subr.bf16.mxu1 %v4320_v6  ;;  %v3869_v10 = vld [vmem:[%s5210_s5 + $0x50] sm:$0xff]  ;;  %v4328_v12 = vpack.c.bf16 %v3868_v9, %v3867_v11  ;;  %v3879_v11 = vld [vmem:[#allocation5 + $0x11] ss:$0 sm:$0xff] }
 0xf66   :  { %4216 = vmatmul.mubr.msk.f32.vlgmr.msra.gmra.mrb[30].mxu0 %vm211_vm2, %v2754_v14  ;;  %4323 = vmatpush3.bf16.msra.mxu1 %v4320_v6  ;;  %v3870_v14 = vld [vmem:[%s5210_s5 + $0x58] sm:$0xff] }
 0xf67   :  { %4315 = vmatpush3.bf16.msra.mxu0 %v4312_v22  ;;  %4325 = vmatprep.subr.bf16.mxu1 %v4324_v8 }
 0xf68   :  { %4317 = vmatprep.subr.bf16.mxu0 %v4316_v24 }
 0xf6a   :  { %4327 = vmatpush3.bf16.msra.mxu1 %v4324_v8 }
 0xf6b   :  { %4319 = vmatpush3.bf16.msra.mxu0 %v4316_v24 }
 0xf6c   :  { %4329 = vmatprep.subr.bf16.mxu0 %v4328_v12 }
 0xfd3   :  { %v2828_v15 = vpop.f32.mrb[24].mxu0 }
 0xfd4   :  { %v4187_v17 = vpop.f32.mrb[25].mxu0 }
 0xfd5   :  { %v3871_v17 = vld [vmem:[%s5210_s5 + $0x60] sm:$0xff] }
 0xfdb   :  { %v2904_v18 = vpop.f32.mrb[34].mxu1 }
 0xfdc   :  { %v4192_v19 = vpop.f32.mrb[35].mxu1 }
0x102c   :  { %v3056_v25 = vpop.f32.mrb[36].mxu1 }
0x102d   :  { %3368 = vrot.lane.b32.xlu1 %v3056_v25, %s4516_s12  ;;  %v4202_v26 = vpop.f32.mrb[37].mxu1  ;;  %v3858_v25 = vld [vmem:[#allocation5 + $0xe] ss:$0 sm:$0xff] }
0x1030   :  { %v2980_v27 = vpop.f32.mrb[26].mxu0 }
0x1031   :  { %3366 = vrot.lane.b32.xlu0 %v2980_v27, %s4516_s12  ;;  %v4197_v28 = vpop.f32.mrb[27].mxu0 }
0x1032   :  { %v3859_v28 = vld [vmem:[#allocation5 + $0xf] ss:$0 sm:$0xff] }
0x1034   :  { %v3208_v45 = vpop.f32.mrb[38].mxu1 }
0x1035   :  { %v3132_v32 = vpop.f32.mrb[28].mxu0  ;;  %3376 = vrot.lane.b32.xlu1 %v3208_v45, %s4525_s26  ;;  %v4212_v33 = vpop.f32.mrb[39].mxu1 }
0x1036   :  { %3374 = vrot.lane.b32.xlu0 %v3132_v32, %s4525_s26  ;;  %v4207_v34 = vpop.f32.mrb[29].mxu0 }
0x1038   :  { %v3360_v35 = vpop.f32.mrb[40].mxu1 }
0x1039   :  { %v3284_v36 = vpop.f32.mrb[30].mxu0  ;;  %3384 = vrot.lane.b32.xlu1 %v3360_v35, %s4526_s27  ;;  %v4222_v1 = vpop.f32.mrb[41].mxu1 }
0x103a   :  { %3382 = vrot.lane.b32.xlu0 %v3284_v36, %s4526_s27  ;;  %v4217_v29 = vpop.f32.mrb[31].mxu0  ;;  %v3873_v1 = vld [vmem:[%s5210_s5 + $0x70] sm:$0xff] }
0x103b   :  { %v3874_v29 = vld [vmem:[%s5210_s5 + $0x78] sm:$0xff] }
0x109f   :  { %v3369_v30 = vpop.permute.xlu1 %3368 }
0x10a0   :  { %v3389_v47 = vsel %vm211_vm2, %v2904_v18, %v3369_v30  ;;  %v3872_v18 = vld [vmem:[%s5210_s5 + $0x68] sm:$0xff]  ;;  %v4340_v30 = vpack.c.bf16 %v3874_v29, %v3873_v1  ;;  %s4527_s5 = smov [#allocation7]  }
0x10a1   :  { %v4336_v19 = vpack.c.bf16 %v3872_v18, %v3871_v17  ;;  %s3763_s1 = sshll.u32 %s4527_s5, 4  ;;  %s3764_s1 = int_to_ptr.vmem [resolvable:$true] %s3763_s1 }
0x10a2   :  { %s4486_s25 = scalar_lea.vmem %s3764_s1, 256  ;;  %p4491_p3 = scmp.lt.s32.totalorder %s3764_s1, %s3764_s1 }
0x10a3   :  { %v3367_v0 = vpop.permute.xlu0 %3366  ;;  %p4487_p2 = scmp.ne.s32.totalorder %s3764_s1, %s4486_s25  ;;  %p4492_p4 = scmp.lt.s32.totalorder %s4486_s25, %s4486_s25 }
0x10a4   :  { %v3388_v39 = vsel %vm211_vm2, %v2828_v15, %v3367_v0  ;;  %v4332_v15 = vpack.c.bf16 %v3870_v14, %v3869_v10  ;;  %v3864_v0 = vld [vmem:[#allocation5 + $0xa] ss:$0 sm:$0xff] }
0x10a5   :  { %p4493_p5 = por %p4492_p4, %p4491_p3 }
0x10a7   :  { %v3377_v38 = vpop.permute.xlu1 %3376  ;;  %p4494_p6 = pnand %p4493_p5, %p4487_p2 }
0x10a8   :  { %v3375_v40 = vpop.permute.xlu0 %3374  ;;  %v3391_v49 = vsel %vm1568_vm3, %v3389_v47, %v3377_v38 }
0x10a9   :  { %v3390_v41 = vsel %vm1568_vm3, %v3388_v39, %v3375_v40 }
0x10ab   :  { %v3385_v43 = vpop.permute.xlu1 %3384 }
0x10ac   :  { %v3393_v42 = vsel %vm1571_vm4, %v3391_v49, %v3385_v43  ;;  %v3383_v44 = vpop.permute.xlu0 %3382 }
0x10ad   :  { %v3392_v46 = vsel %vm1571_vm4, %v3390_v41, %v3383_v44  ;;  %v3877_v41 = vld [vmem:[#allocation5 + $0xb] ss:$0 sm:$0xff] }
0x10ae   :  { %4231 = vmatprep.mubr.msk.f32.mxu0 %vm67_vm0, %v3392_v46 }
0x10af   :  { %4232 = vmatmul.mubr.msk.f32.vlgmr.msra.gmra.mrb[32].mxu0 %vm67_vm0, %v3393_v42 }
0x10b0   :  { %4331 = vmatpush3.bf16.msra.mxu0 %v4328_v12 }
0x10b1   :  { %4333 = vmatprep.subr.bf16.mxu0 %v4332_v15 }
0x10b4   :  { %4335 = vmatpush3.bf16.msra.mxu0 %v4332_v15 }
0x10b5   :  { %4337 = vmatprep.subr.bf16.mxu0 %v4336_v19 }
0x10b8   :  { %4339 = vmatpush3.bf16.msra.mxu0 %v4336_v19 }
0x10b9   :  { %4341 = vmatprep.subr.bf16.mxu0 %v4340_v30 }
0x10bc   :  { %4343 = vmatpush3.bf16.msra.mxu0 %v4340_v30 }
0x1182   :  { %v4233_v51 = vpop.f32.mrb[32].mxu0 }
0x1183   :  { %v3481_v52 = vadd.f32 %v4233_v51, %v4899_v48  ;;  %v3471_v53 = vpop.f32.mrb[33].mxu0 }
0x1184   :  { %v3480_v54 = vadd.f32 %v3471_v53, %v4901_v31 }
0x1185   :  { %v5130_v55 = vadd.f32 %v3857_v50, %v3481_v52 }
0x1186   :  { %v5132_v13 = vadd.f32 %v3857_v50, %v3480_v54 }
0x1187   :  { %v3491_v16 = vsel %vm67_vm0, %v5130_v55, 0.0 }
0x1188   :  { %3492 = vadd.xlane.f32.xlu1 %v3491_v16  ;;  %v3488_v56 = vsel %vm67_vm0, %v5132_v13, 0.0 }
0x1189   :  { %3489 = vadd.xlane.f32.xlu0 %v3488_v56 }
0x1215   :  { %v3493_v58 = vpop.xlane.xlu1 %3492 }
0x1216   :  { %v3495_v59 = vmul.f32 0.03125, %v3493_v58  ;;  %v3490_v60 = vpop.xlane.xlu0 %3489 }
0x1217   :  { %v3494_v61 = vmul.f32 0.03125, %v3490_v60 }
0x1218   :  { %v3497_v48 = vsub.f32 %v5130_v55, %v3495_v59 }
0x1219   :  { %v3496_v31 = vsub.f32 %v5132_v13, %v3494_v61 }
0x121a   :  { %v3499_v3 = vmul.f32 %v3497_v48, %v3497_v48  ;;  %v3513_v32 = vmul.f32 %v3858_v25, %v3497_v48 }
0x121b   :  { %v3498_v62 = vmul.f32 %v3496_v31, %v3496_v31  ;;  %v3512_v26 = vmul.f32 %v3858_v25, %v3496_v31 }
0x121c   :  { %v3503_v4 = vsel %vm67_vm0, %v3499_v3, 0.0 }
0x121d   :  { %v3500_v2 = vsel %vm67_vm0, %v3498_v62, 0.0 }
0x121e   :  { %3501 = vadd.xlane.f32.xlu0 %v3500_v2 }
0x1222   :  { %3504 = vadd.xlane.f32.xlu0 %v3503_v4 }
0x12ab   :  { %v3502_v20 = vpop.xlane.xlu0 %3501 }
0x12ac   :  { %v3506_v21 = vmul.f32 0.032258064, %v3502_v20 }
0x12ae   :  { %v3514_v22 = vadd.f32 1e-32, %v3506_v21 }
0x12af   :  { %v3505_v37 = vpop.xlane.xlu0 %3504 }
0x12b0   :  { %4434 = vrsqrt.f32 %v3514_v22  ;;  %v3507_v23 = vmul.f32 0.032258064, %v3505_v37 }
0x12b2   :  { %v3515_v24 = vadd.f32 1e-32, %v3507_v23 }
0x12b4   :  { %4436 = vrsqrt.f32 %v3515_v24 }
0x12ba   :  { %v4435_v27 = vpop.eup %4434 }
0x12bb   :  { %v3518_v45 = vmul.f32 %v4435_v27, %v3512_v26 }
0x12bd   :  { %v3524_v33 = vadd.f32 %v3859_v28, %v3518_v45 }
0x12be   :  { %v4437_v34 = vpop.eup %4436 }
0x12bf   :  { %v3519_v35 = vmul.f32 %v4437_v34, %v3513_v32  ;;  %4242 = vmatprep.mubr.msk.f32.mxu1 %vm67_vm0, %v3524_v33 }
0x12c1   :  { %v3525_v36 = vadd.f32 %v3859_v28, %v3519_v35 }
0x12c3   :  { %4243 = vmatmul.mubr.msk.f32.vlgmr.msra.gmra.mrb[42].mxu1 %vm67_vm0, %v3525_v36 }
0x1396   :  { %v4244_v38 = vpop.f32.mrb[42].mxu1 }
0x1397   :  { %v3613_v40 = vadd.f32 %v4244_v38, %v3864_v0  ;;  %v3607_v47 = vpop.f32.mrb[43].mxu1 }
0x1398   :  { %v3608_v39 = vadd.f32 %v3864_v0, %v3607_v47 }
0x1399   :  { %v3617_v43 = vmax.f32 %v3613_v40, 0.0 }
0x139a   :  { %v3616_v49 = vmax.f32 %v3608_v39, 0.0 }
0x139c   :  { %4261 = vmatprep.mubr.msk.f32.mxu0 %vm1804_vm5, %v3616_v49 }
0x139d   :  { %4262 = vmatmul.mubr.msk.f32.vlgmr.msra.gmra.mrb[34].mxu0 %vm1804_vm5, %v3617_v43 }
0x1470   :  { %v4263_v42 = vpop.f32.mrb[34].mxu0 }
0x1471   :  { %v3709_v44 = vadd.f32 %v4263_v42, %v5130_v55  ;;  %v3699_v46 = vpop.f32.mrb[35].mxu0 }
0x1472   :  { %v3708_v50 = vadd.f32 %v3699_v46, %v5132_v13 }
0x1473   :  { %v3715_v51 = vadd.f32 %v3877_v41, %v3709_v44 }
0x1474   :  { %v3714_v52 = vadd.f32 %v3877_v41, %v3708_v50 }
0x1475   :  { %v3721_v53 = vsel %vm67_vm0, %v3715_v51, 0.0 }
0x1476   :  { %3722 = vadd.xlane.f32.xlu1 %v3721_v53  ;;  %v3718_v54 = vsel %vm67_vm0, %v3714_v52, 0.0 }
0x1477   :  { %3719 = vadd.xlane.f32.xlu0 %v3718_v54 }
0x1503   :  { %v3723_v16 = vpop.xlane.xlu1 %3722 }
0x1504   :  { %v3725_v56 = vmul.f32 0.03125, %v3723_v16  ;;  %v3720_v58 = vpop.xlane.xlu0 %3719 }
0x1505   :  { %v3724_v59 = vmul.f32 0.03125, %v3720_v58 }
0x1506   :  { %v3727_v60 = vsub.f32 %v3715_v51, %v3725_v56 }
0x1507   :  { %v3726_v61 = vsub.f32 %v3714_v52, %v3724_v59 }
0x1508   :  { %v3729_v48 = vmul.f32 %v3727_v60, %v3727_v60  ;;  %v3743_v6 = vmul.f32 %v3878_v5, %v3727_v60 }
0x1509   :  { %v3728_v31 = vmul.f32 %v3726_v61, %v3726_v61  ;;  %v3742_v8 = vmul.f32 %v3878_v5, %v3726_v61 }
0x150a   :  { %v3733_v55 = vsel %vm67_vm0, %v3729_v48, 0.0 }
0x150b   :  { %3734 = vadd.xlane.f32.xlu1 %v3733_v55  ;;  %v3730_v13 = vsel %vm67_vm0, %v3728_v31, 0.0 }
0x150c   :  { %3731 = vadd.xlane.f32.xlu0 %v3730_v13 }
0x1598   :  { %v3735_v62 = vpop.xlane.xlu1 %3734 }
0x1599   :  { %v3737_v2 = vmul.f32 0.032258064, %v3735_v62  ;;  %v3732_v3 = vpop.xlane.xlu0 %3731 }
0x159a   :  { %v3736_v4 = vmul.f32 0.032258064, %v3732_v3 }
0x159b   :  { %v3745_v57 = vadd.f32 1e-32, %v3737_v2 }
0x159c   :  { %v3744_v63 = vadd.f32 1e-32, %v3736_v4 }
0x159d   :  { %4438 = vrsqrt.f32 %v3745_v57 }
0x159e   :  { %4440 = vrsqrt.f32 %v3744_v63 }
0x15a7   :  { %v4439_v7 = vpop.eup %4438 }
0x15a8   :  { %v4441_v9 = vpop.eup %4440  ;;  %v3749_v10 = vmul.f32 %v4439_v7, %v3743_v6 }
0x15a9   :  { %v3748_v12 = vmul.f32 %v4441_v9, %v3742_v8 }
0x15aa   :  { %v3755_v14 = vadd.f32 %v3879_v11, %v3749_v10 }
0x15ab   :  { %v3754_v15 = vadd.f32 %v3879_v11, %v3748_v12 }
0x15ac   :  { %3757 = vst.msk [vmem:[#allocation7 + $0x8] sm:$0xff] %vm67_vm0, %v3755_v14 }
0x15ad   :  { %3756 = vst.msk [vmem:[#allocation7] sm:$0xff] %vm67_vm0, %v3754_v15 }
0x15ae   :  { %4497 = shalt.err (!%p4494_p6)
}
0x15af   :  { %s4498_s26 = scalar_lea.hbm %s5212_s7, 256 }
0x15b0   :  { %p4499_p7 = scmp.ne.s32.totalorder %s5212_s7, %s4498_s26  ;;  %p4502_p8 = scmp.lt.u32.totalorder %s4498_s26, %s5212_s7 }
0x15b2   :  { %p4504_p9 = pnand %p4502_p8, %p4499_p7 }
0x15b4   :  { %4507 = shalt.err (!%p4504_p9)
}
0x15b5   :  { %3769 = dma.vmem_to_hbm [thread:$0]  %s3764_s1, 256, %s5212_s7, [#allocation4], %s4515_s11, %s4515_s11, %s4516_s12  }
0x15b6   :  { %4512 = dma.done.wait [#allocation4], 256  }
0x15b7   :  { %4513 = vsyncadd [#allocation4], 4294967040 }
0x15b8   :  { %3773 = vsyncpa [#allocation3], 1 }
0x15b9   :  { %3774 = vsyncpa [#allocation6], 1 }
0x15ba   :  { %3775 = vsyncpa [#allocation4], 1 }

</bundles_post_ra>
